<compile_context>
chip_gen: v5e
topology: v5e:2x2
jax: 0.10.0
libtpu: 0.0.40
codegen_flags: <defaults>
</compile_context>

<pallas_src>
import jax
import jax.numpy as jnp
from jax import lax
from jax.experimental import pallas as pl
from jax.experimental.pallas import tpu as pltpu

KSIZE = 7            # spatial-attention conv kernel (7x7x7, padding=3)
PAD = KSIZE // 2


# ----------------------------------------------------------------------------
# Fused kernel: one batch element per grid step.
#   gate  = sigmoid(W2 @ relu(W1 @ avgpool(x) + b1) + b2)        (per channel)
#   ca    = gate * x
#   stats = [max_c(ca), mean_c(ca)]                              (per voxel)
#   att   = sigmoid(conv7x7x7(stats) + bsp)                      (per voxel)
#   out   = att * ca
# ----------------------------------------------------------------------------
def _cbam_fused_kernel(x_ref, w1t_ref, b1_ref, w2_ref, b2_ref, tmat_ref,
                       bsp_ref, out_ref, pad_ref):
    x = x_ref[0]                                         # (C, D, HW) f32
    C, D, HW = x.shape
    inv_dhw = 1.0 / float(D * HW)

    # ---- channel attention gate: global avg pool + tiny channel MLP ----
    s = jnp.sum(x, axis=2)                               # (C, D)  lane reduce
    pooled = jnp.sum(s, axis=1, keepdims=True) * inv_dhw  # (C, 1)
    # w1t: (C, Cr) = W1.T ; b1: (1, Cr) ; w2: (C, Cr) ; b2: (C, 1)
    h = jnp.sum(w1t_ref[...] * pooled, axis=0, keepdims=True)    # (1, Cr)
    h = jnp.maximum(h + b1_ref[...], 0.0)                        # ReLU
    g = jnp.sum(w2_ref[...] * h, axis=1, keepdims=True)          # (C, 1)
    gate = jax.nn.sigmoid(g + b2_ref[...])                       # (C, 1)

    ca = x * gate.reshape(C, 1, 1)                       # (C, D, HW)

    # ---- per-voxel channel stats, written into a D-padded VMEM scratch ----
    # pad_ref: (2, D + 2*PAD, HW); rows [PAD, PAD+D) hold the stats, the
    # border rows stay zero (this is the "same"-conv padding along D).
    pad_ref[...] = jnp.zeros_like(pad_ref)
    pad_ref[0, pl.ds(PAD, D), :] = jnp.max(ca, axis=0)            # channel max
    pad_ref[1, pl.ds(PAD, D), :] = jnp.sum(ca, axis=0) * (1.0 / C)  # channel mean

    # ---- 7x7x7 conv as 2*7 = 14 MXU matmuls over the flattened H*W axis ----
    # tmat_ref[c, kd] is an (HW, HW) banded Toeplitz matrix holding the
    # (kh, kw) taps for that (stat-channel, depth-offset); H/W zero padding is
    # already baked into its zeros.  Use 4 partial accumulators to avoid a
    # long serial add chain.
    accs = [jnp.zeros((D, HW), jnp.float32) for _ in range(4)]
    accs[0] = accs[0] + bsp_ref[0]
    i = 0
    for c in range(2):
        for kd in range(KSIZE):
            sl = pad_ref[c, pl.ds(kd, D), :]              # (D, HW), D-shifted tap
            accs[i % 4] = accs[i % 4] + jnp.dot(
                sl, tmat_ref[c, kd], preferred_element_type=jnp.float32)
            i += 1
    att = jax.nn.sigmoid((accs[0] + accs[1]) + (accs[2] + accs[3]))  # (D, HW)

    out_ref[0] = ca * att[None, :, :]


# ----------------------------------------------------------------------------
# Wrapper glue: parameter reshapes + Toeplitz construction (weights only).
# ----------------------------------------------------------------------------
def _build_hw_toeplitz(Wsp, H, W):
    """T[c, kd, hw_in, hw_out] = Wsp[0, c, kd, h_in-h_out+PAD, w_in-w_out+PAD],
    zero where the tap falls outside the 7x7 window (i.e. the H/W "same"
    padding is baked into the matrix)."""
    HW = H * W
    hw = jnp.arange(HW)
    h_idx = hw // W
    w_idx = hw % W
    dh = h_idx[:, None] - h_idx[None, :] + PAD            # (HW_in, HW_out)
    dw = w_idx[:, None] - w_idx[None, :] + PAD
    valid = (dh >= 0) & (dh < KSIZE) & (dw >= 0) & (dw < KSIZE)
    dh_c = jnp.clip(dh, 0, KSIZE - 1)
    dw_c = jnp.clip(dw, 0, KSIZE - 1)
    taps = Wsp[0][:, :, dh_c, dw_c]                       # (2, KSIZE, HW, HW)
    return taps * valid[None, None, :, :].astype(Wsp.dtype)


def cbam_block_3d(x, W1, b1, W2, b2, Wsp, bsp):
    B, C, D, H, W = x.shape
    Cr = W1.shape[0]
    HW = H * W

    x_l = x.reshape(B, C, D, HW)          # lane-dense: trailing axis = H*W
    w1_t = W1.T                           # (C, Cr)
    b1_row = b1.reshape(1, Cr)
    b2_col = b2.reshape(C, 1)
    tmat = _build_hw_toeplitz(Wsp, H, W)  # (2, 7, HW, HW)

    out = pl.pallas_call(
        _cbam_fused_kernel,
        grid=(B,),
        in_specs=[
            pl.BlockSpec((1, C, D, HW), lambda b: (b, 0, 0, 0)),
            pl.BlockSpec((C, Cr), lambda b: (0, 0)),
            pl.BlockSpec((1, Cr), lambda b: (0, 0)),
            pl.BlockSpec((C, Cr), lambda b: (0, 0)),
            pl.BlockSpec((C, 1), lambda b: (0, 0)),
            pl.BlockSpec((2, KSIZE, HW, HW), lambda b: (0, 0, 0, 0)),
            pl.BlockSpec(memory_space=pltpu.MemorySpace.SMEM),
        ],
        out_specs=pl.BlockSpec((1, C, D, HW), lambda b: (b, 0, 0, 0)),
        out_shape=jax.ShapeDtypeStruct((B, C, D, HW), jnp.float32),
        scratch_shapes=[pltpu.VMEM((2, D + 2 * PAD, HW), jnp.float32)],
        compiler_params=pltpu.CompilerParams(
            dimension_semantics=("parallel",),
            vmem_limit_bytes=32 * 1024 * 1024,   # explicit budget; working set << 1 MiB here
        ),
    )(x_l, w1_t, b1_row, W2, b2_col, tmat, bsp)

    return out.reshape(B, C, D, H, W)


# ----------------------------------------------------------------------------
# Pure-JAX reference (for correctness check)
# ----------------------------------------------------------------------------
def reference(x, W1, b1, W2, b2, Wsp, bsp):
    pooled = jnp.mean(x, axis=(2, 3, 4), keepdims=True)
    h = jnp.einsum('oc,bcdhw->bodhw', W1, pooled,
                   precision=lax.Precision.HIGHEST) + b1.reshape(1, -1, 1, 1, 1)
    h = jax.nn.relu(h)
    g = jnp.einsum('oc,bcdhw->bodhw', W2, h,
                   precision=lax.Precision.HIGHEST) + b2.reshape(1, -1, 1, 1, 1)
    gate = jax.nn.sigmoid(g)
    ca = gate * x
    stats = jnp.concatenate([jnp.max(ca, axis=1, keepdims=True),
                             jnp.mean(ca, axis=1, keepdims=True)], axis=1)
    conv = lax.conv_general_dilated(
        stats, Wsp, window_strides=(1, 1, 1),
        padding=((PAD, PAD), (PAD, PAD), (PAD, PAD)),
        dimension_numbers=('NCDHW', 'OIDHW', 'NCDHW'),
        precision=lax.Precision.HIGHEST) + bsp.reshape(1, 1, 1, 1, 1)
    att = jax.nn.sigmoid(conv)
    return att * ca


if __name__ == "__main__":
    # C must be divisible by 8 (channels//8 hidden dim); H*W = 128 -> full lane width.
    B, C, D, H, W = 2, 16, 8, 8, 16
    Cr = C // 8

    key = jax.random.PRNGKey(0)
    ks = jax.random.split(key, 7)
    x = jax.random.normal(ks[0], (B, C, D, H, W), jnp.float32)

    # Deterministic synthetic parameters (shapes from the PyTorch __init__):
    W1 = jax.random.normal(ks[1], (Cr, C), jnp.float32) * 0.3        # Conv3d(C, C//8, 1)
    b1 = jax.random.normal(ks[2], (Cr,), jnp.float32) * 0.1
    W2 = jax.random.normal(ks[3], (C, Cr), jnp.float32) * 0.3        # Conv3d(C//8, C, 1)
    b2 = jax.random.normal(ks[4], (C,), jnp.float32) * 0.1
    Wsp = jax.random.normal(ks[5], (1, 2, KSIZE, KSIZE, KSIZE), jnp.float32) * 0.05
    bsp = jax.random.normal(ks[6], (1,), jnp.float32) * 0.1          # Conv3d(2, 1, 7, pad=3)

    out = cbam_block_3d(x, W1, b1, W2, b2, Wsp, bsp)
    out = jax.block_until_ready(out)

    ref = reference(x, W1, b1, W2, b2, Wsp, bsp)
    err = float(jnp.max(jnp.abs(out - ref)))
    # The conv now runs on the MXU; f32 matmuls at default precision use bf16
    # passes, so allow a few e-3 of absolute error vs the HIGHEST-precision ref.
    assert err < 5e-3, f"max abs error too large: {err}"
    print("KERNEL_OK")
</pallas_src>

<mosaic_0001>
module attributes {stable_mosaic.version = 11 : i64} {
  func.func @_cbam_fused_kernel(%arg0: i32, %arg1: memref<1x16x8x128xf32, #tpu.memory_space<vmem>>, %arg2: memref<16x2xf32, #tpu.memory_space<vmem>>, %arg3: memref<1x2xf32, #tpu.memory_space<vmem>>, %arg4: memref<16x2xf32, #tpu.memory_space<vmem>>, %arg5: memref<16x1xf32, #tpu.memory_space<vmem>>, %arg6: memref<2x7x128x128xf32, #tpu.memory_space<vmem>>, %arg7: memref<1xf32, #tpu.memory_space<smem>>, %arg8: memref<1x16x8x128xf32, #tpu.memory_space<vmem>>, %arg9: memref<2x14x128xf32, #tpu.memory_space<vmem>>) attributes {dimension_semantics = [#tpu.dimension_semantics<parallel>], iteration_bounds = array<i64: 2>, scalar_prefetch = 0 : i64, scratch_operands = 1 : i64, tpu.core_type = #tpu.core_type<tc>, window_params = [{transform_indices = @transform_0, window_bounds = array<i64: 1, 16, 8, 128>}, {pipeline_mode = #tpu.pipeline_mode<synchronous>, transform_indices = @transform_1, window_bounds = array<i64: 16, 2>}, {pipeline_mode = #tpu.pipeline_mode<synchronous>, transform_indices = @transform_2, window_bounds = array<i64: 1, 2>}, {pipeline_mode = #tpu.pipeline_mode<synchronous>, transform_indices = @transform_3, window_bounds = array<i64: 16, 2>}, {pipeline_mode = #tpu.pipeline_mode<synchronous>, transform_indices = @transform_4, window_bounds = array<i64: 16, 1>}, {pipeline_mode = #tpu.pipeline_mode<synchronous>, transform_indices = @transform_5, window_bounds = array<i64: 2, 7, 128, 128>}, {transform_indices = @transform_6, window_bounds = array<i64: 1>}, {transform_indices = @transform_7, window_bounds = array<i64: 1, 16, 8, 128>}]} {
    %c0 = arith.constant 0 : index
    %c0_0 = arith.constant 0 : index
    %c0_1 = arith.constant 0 : index
    %c0_2 = arith.constant 0 : index
    %0 = vector.load %arg1[%c0, %c0_0, %c0_1, %c0_2] : memref<1x16x8x128xf32, #tpu.memory_space<vmem>>, vector<1x16x8x128xf32>
    %1 = vector.shape_cast %0 : vector<1x16x8x128xf32> to vector<16x8x128xf32>
    %cst = arith.constant dense<0.000000e+00> : vector<16x8xf32>
    %2 = vector.multi_reduction <add>, %1, %cst [2] : vector<16x8x128xf32> to vector<16x8xf32>
    %cst_3 = arith.constant dense<0.000000e+00> : vector<16xf32>
    %3 = vector.multi_reduction <add>, %2, %cst_3 [1] : vector<16x8xf32> to vector<16xf32>
    %4 = vector.shape_cast %3 : vector<16xf32> to vector<16x1xf32>
    %cst_4 = arith.constant 9.765625E-4 : f32
    %5 = vector.broadcast %cst_4 : f32 to vector<16x1xf32>
    %6 = arith.mulf %4, %5 : vector<16x1xf32>
    %c0_5 = arith.constant 0 : index
    %c0_6 = arith.constant 0 : index
    %7 = vector.load %arg2[%c0_5, %c0_6] : memref<16x2xf32, #tpu.memory_space<vmem>>, vector<16x2xf32>
    %8 = vector.broadcast %6 : vector<16x1xf32> to vector<16x2xf32>
    %9 = arith.mulf %7, %8 : vector<16x2xf32>
    %cst_7 = arith.constant dense<0.000000e+00> : vector<2xf32>
    %10 = vector.multi_reduction <add>, %9, %cst_7 [0] : vector<16x2xf32> to vector<2xf32>
    %11 = vector.shape_cast %10 : vector<2xf32> to vector<1x2xf32>
    %c0_8 = arith.constant 0 : index
    %c0_9 = arith.constant 0 : index
    %12 = vector.load %arg3[%c0_8, %c0_9] : memref<1x2xf32, #tpu.memory_space<vmem>>, vector<1x2xf32>
    %13 = arith.addf %11, %12 : vector<1x2xf32>
    %cst_10 = arith.constant 0.000000e+00 : f32
    %14 = vector.broadcast %cst_10 : f32 to vector<1x2xf32>
    %15 = arith.maximumf %13, %14 : vector<1x2xf32>
    %c0_11 = arith.constant 0 : index
    %c0_12 = arith.constant 0 : index
    %16 = vector.load %arg4[%c0_11, %c0_12] : memref<16x2xf32, #tpu.memory_space<vmem>>, vector<16x2xf32>
    %17 = vector.broadcast %15 : vector<1x2xf32> to vector<16x2xf32>
    %18 = arith.mulf %16, %17 : vector<16x2xf32>
    %cst_13 = arith.constant dense<0.000000e+00> : vector<16xf32>
    %19 = vector.multi_reduction <add>, %18, %cst_13 [1] : vector<16x2xf32> to vector<16xf32>
    %20 = vector.shape_cast %19 : vector<16xf32> to vector<16x1xf32>
    %c0_14 = arith.constant 0 : index
    %c0_15 = arith.constant 0 : index
    %21 = vector.load %arg5[%c0_14, %c0_15] : memref<16x1xf32, #tpu.memory_space<vmem>>, vector<16x1xf32>
    %22 = arith.addf %20, %21 : vector<16x1xf32>
    %23 = arith.negf %22 : vector<16x1xf32>
    %24 = math.exp %23 : vector<16x1xf32>
    %cst_16 = arith.constant 1.000000e+00 : f32
    %25 = vector.broadcast %cst_16 : f32 to vector<16x1xf32>
    %26 = arith.addf %25, %24 : vector<16x1xf32>
    %27 = arith.divf %25, %26 : vector<16x1xf32>
    %28 = vector.shape_cast %27 : vector<16x1xf32> to vector<16x1x1xf32>
    %29 = vector.broadcast %28 : vector<16x1x1xf32> to vector<16x8x128xf32>
    %30 = arith.mulf %1, %29 : vector<16x8x128xf32>
    %cst_17 = arith.constant 0.000000e+00 : f32
    %31 = vector.broadcast %cst_17 : f32 to vector<2x14x128xf32>
    %c0_18 = arith.constant 0 : index
    %c0_19 = arith.constant 0 : index
    %c0_20 = arith.constant 0 : index
    %32 = vector.load %arg9[%c0_18, %c0_19, %c0_20] : memref<2x14x128xf32, #tpu.memory_space<vmem>>, vector<2x14x128xf32>
    tpu.vector_store %arg9[%c0_18, %c0_19, %c0_20], %31 {strides = array<i32>} : memref<2x14x128xf32, #tpu.memory_space<vmem>>, vector<2x14x128xf32>,
    %cst_21 = arith.constant dense<0xFF800000> : vector<8x128xf32>
    %33 = vector.multi_reduction <maximumf>, %30, %cst_21 [0] : vector<16x8x128xf32> to vector<8x128xf32>
    %c0_22 = arith.constant 0 : index
    %c3 = arith.constant 3 : index
    %c0_23 = arith.constant 0 : index
    %34 = vector.load %arg9[%c0_22, %c3, %c0_23] : memref<2x14x128xf32, #tpu.memory_space<vmem>>, vector<1x8x128xf32>
    %35 = vector.shape_cast %34 : vector<1x8x128xf32> to vector<8x128xf32>
    %36 = vector.shape_cast %33 : vector<8x128xf32> to vector<1x8x128xf32>
    tpu.vector_store %arg9[%c0_22, %c3, %c0_23], %36 {strides = array<i32>} : memref<2x14x128xf32, #tpu.memory_space<vmem>>, vector<1x8x128xf32>,
    %cst_24 = arith.constant dense<0.000000e+00> : vector<8x128xf32>
    %37 = vector.multi_reduction <add>, %30, %cst_24 [0] : vector<16x8x128xf32> to vector<8x128xf32>
    %cst_25 = arith.constant 6.250000e-02 : f32
    %38 = vector.broadcast %cst_25 : f32 to vector<8x128xf32>
    %39 = arith.mulf %37, %38 : vector<8x128xf32>
    %c1 = arith.constant 1 : index
    %c3_26 = arith.constant 3 : index
    %c0_27 = arith.constant 0 : index
    %40 = vector.load %arg9[%c1, %c3_26, %c0_27] : memref<2x14x128xf32, #tpu.memory_space<vmem>>, vector<1x8x128xf32>
    %41 = vector.shape_cast %40 : vector<1x8x128xf32> to vector<8x128xf32>
    %42 = vector.shape_cast %39 : vector<8x128xf32> to vector<1x8x128xf32>
    tpu.vector_store %arg9[%c1, %c3_26, %c0_27], %42 {strides = array<i32>} : memref<2x14x128xf32, #tpu.memory_space<vmem>>, vector<1x8x128xf32>,
    %cst_28 = arith.constant 0.000000e+00 : f32
    %43 = vector.broadcast %cst_28 : f32 to vector<8x128xf32>
    %cst_29 = arith.constant 0.000000e+00 : f32
    %44 = vector.broadcast %cst_29 : f32 to vector<8x128xf32>
    %cst_30 = arith.constant 0.000000e+00 : f32
    %45 = vector.broadcast %cst_30 : f32 to vector<8x128xf32>
    %cst_31 = arith.constant 0.000000e+00 : f32
    %46 = vector.broadcast %cst_31 : f32 to vector<8x128xf32>
    %c0_32 = arith.constant 0 : index
    %47 = memref.load %arg7[%c0_32] : memref<1xf32, #tpu.memory_space<smem>>
    %48 = vector.broadcast %47 : f32 to vector<8x128xf32>
    %49 = arith.addf %43, %48 : vector<8x128xf32>
    %c0_33 = arith.constant 0 : index
    %c0_34 = arith.constant 0 : index
    %c0_35 = arith.constant 0 : index
    %50 = vector.load %arg9[%c0_33, %c0_34, %c0_35] : memref<2x14x128xf32, #tpu.memory_space<vmem>>, vector<1x8x128xf32>
    %51 = vector.shape_cast %50 : vector<1x8x128xf32> to vector<8x128xf32>
    %c0_36 = arith.constant 0 : index
    %c0_37 = arith.constant 0 : index
    %c0_38 = arith.constant 0 : index
    %c0_39 = arith.constant 0 : index
    %52 = vector.load %arg6[%c0_36, %c0_37, %c0_38, %c0_39] : memref<2x7x128x128xf32, #tpu.memory_space<vmem>>, vector<1x1x128x128xf32>
    %53 = vector.shape_cast %52 : vector<1x1x128x128xf32> to vector<128x128xf32>
    %cst_40 = arith.constant dense<0.000000e+00> : vector<8x128xf32>
    %54 = tpu.matmul %51, %53, %cst_40 {dimension_numbers = #tpu.dot_dimension_numbers<[1], [0], [0], [1], [0, 0, 1, 1], [], []>} : vector<8x128xf32>, vector<128x128xf32>, vector<8x128xf32> -> vector<8x128xf32>
    %55 = arith.addf %49, %54 : vector<8x128xf32>
    %c0_41 = arith.constant 0 : index
    %c1_42 = arith.constant 1 : index
    %c0_43 = arith.constant 0 : index
    %56 = vector.load %arg9[%c0_41, %c1_42, %c0_43] : memref<2x14x128xf32, #tpu.memory_space<vmem>>, vector<1x8x128xf32>
    %57 = vector.shape_cast %56 : vector<1x8x128xf32> to vector<8x128xf32>
    %c0_44 = arith.constant 0 : index
    %c1_45 = arith.constant 1 : index
    %c0_46 = arith.constant 0 : index
    %c0_47 = arith.constant 0 : index
    %58 = vector.load %arg6[%c0_44, %c1_45, %c0_46, %c0_47] : memref<2x7x128x128xf32, #tpu.memory_space<vmem>>, vector<1x1x128x128xf32>
    %59 = vector.shape_cast %58 : vector<1x1x128x128xf32> to vector<128x128xf32>
    %cst_48 = arith.constant dense<0.000000e+00> : vector<8x128xf32>
    %60 = tpu.matmul %57, %59, %cst_48 {dimension_numbers = #tpu.dot_dimension_numbers<[1], [0], [0], [1], [0, 0, 1, 1], [], []>} : vector<8x128xf32>, vector<128x128xf32>, vector<8x128xf32> -> vector<8x128xf32>
    %61 = arith.addf %44, %60 : vector<8x128xf32>
    %c0_49 = arith.constant 0 : index
    %c2 = arith.constant 2 : index
    %c0_50 = arith.constant 0 : index
    %62 = vector.load %arg9[%c0_49, %c2, %c0_50] : memref<2x14x128xf32, #tpu.memory_space<vmem>>, vector<1x8x128xf32>
    %63 = vector.shape_cast %62 : vector<1x8x128xf32> to vector<8x128xf32>
    %c0_51 = arith.constant 0 : index
    %c2_52 = arith.constant 2 : index
    %c0_53 = arith.constant 0 : index
    %c0_54 = arith.constant 0 : index
    %64 = vector.load %arg6[%c0_51, %c2_52, %c0_53, %c0_54] : memref<2x7x128x128xf32, #tpu.memory_space<vmem>>, vector<1x1x128x128xf32>
    %65 = vector.shape_cast %64 : vector<1x1x128x128xf32> to vector<128x128xf32>
    %cst_55 = arith.constant dense<0.000000e+00> : vector<8x128xf32>
    %66 = tpu.matmul %63, %65, %cst_55 {dimension_numbers = #tpu.dot_dimension_numbers<[1], [0], [0], [1], [0, 0, 1, 1], [], []>} : vector<8x128xf32>, vector<128x128xf32>, vector<8x128xf32> -> vector<8x128xf32>
    %67 = arith.addf %45, %66 : vector<8x128xf32>
    %c0_56 = arith.constant 0 : index
    %c3_57 = arith.constant 3 : index
    %c0_58 = arith.constant 0 : index
    %68 = vector.load %arg9[%c0_56, %c3_57, %c0_58] : memref<2x14x128xf32, #tpu.memory_space<vmem>>, vector<1x8x128xf32>
    %69 = vector.shape_cast %68 : vector<1x8x128xf32> to vector<8x128xf32>
    %c0_59 = arith.constant 0 : index
    %c3_60 = arith.constant 3 : index
    %c0_61 = arith.constant 0 : index
    %c0_62 = arith.constant 0 : index
    %70 = vector.load %arg6[%c0_59, %c3_60, %c0_61, %c0_62] : memref<2x7x128x128xf32, #tpu.memory_space<vmem>>, vector<1x1x128x128xf32>
    %71 = vector.shape_cast %70 : vector<1x1x128x128xf32> to vector<128x128xf32>
    %cst_63 = arith.constant dense<0.000000e+00> : vector<8x128xf32>
    %72 = tpu.matmul %69, %71, %cst_63 {dimension_numbers = #tpu.dot_dimension_numbers<[1], [0], [0], [1], [0, 0, 1, 1], [], []>} : vector<8x128xf32>, vector<128x128xf32>, vector<8x128xf32> -> vector<8x128xf32>
    %73 = arith.addf %46, %72 : vector<8x128xf32>
    %c0_64 = arith.constant 0 : index
    %c4 = arith.constant 4 : index
    %c0_65 = arith.constant 0 : index
    %74 = vector.load %arg9[%c0_64, %c4, %c0_65] : memref<2x14x128xf32, #tpu.memory_space<vmem>>, vector<1x8x128xf32>
    %75 = vector.shape_cast %74 : vector<1x8x128xf32> to vector<8x128xf32>
    %c0_66 = arith.constant 0 : index
    %c4_67 = arith.constant 4 : index
    %c0_68 = arith.constant 0 : index
    %c0_69 = arith.constant 0 : index
    %76 = vector.load %arg6[%c0_66, %c4_67, %c0_68, %c0_69] : memref<2x7x128x128xf32, #tpu.memory_space<vmem>>, vector<1x1x128x128xf32>
    %77 = vector.shape_cast %76 : vector<1x1x128x128xf32> to vector<128x128xf32>
    %cst_70 = arith.constant dense<0.000000e+00> : vector<8x128xf32>
    %78 = tpu.matmul %75, %77, %cst_70 {dimension_numbers = #tpu.dot_dimension_numbers<[1], [0], [0], [1], [0, 0, 1, 1], [], []>} : vector<8x128xf32>, vector<128x128xf32>, vector<8x128xf32> -> vector<8x128xf32>
    %79 = arith.addf %55, %78 : vector<8x128xf32>
    %c0_71 = arith.constant 0 : index
    %c5 = arith.constant 5 : index
    %c0_72 = arith.constant 0 : index
    %80 = vector.load %arg9[%c0_71, %c5, %c0_72] : memref<2x14x128xf32, #tpu.memory_space<vmem>>, vector<1x8x128xf32>
    %81 = vector.shape_cast %80 : vector<1x8x128xf32> to vector<8x128xf32>
    %c0_73 = arith.constant 0 : index
    %c5_74 = arith.constant 5 : index
    %c0_75 = arith.constant 0 : index
    %c0_76 = arith.constant 0 : index
    %82 = vector.load %arg6[%c0_73, %c5_74, %c0_75, %c0_76] : memref<2x7x128x128xf32, #tpu.memory_space<vmem>>, vector<1x1x128x128xf32>
    %83 = vector.shape_cast %82 : vector<1x1x128x128xf32> to vector<128x128xf32>
    %cst_77 = arith.constant dense<0.000000e+00> : vector<8x128xf32>
    %84 = tpu.matmul %81, %83, %cst_77 {dimension_numbers = #tpu.dot_dimension_numbers<[1], [0], [0], [1], [0, 0, 1, 1], [], []>} : vector<8x128xf32>, vector<128x128xf32>, vector<8x128xf32> -> vector<8x128xf32>
    %85 = arith.addf %61, %84 : vector<8x128xf32>
    %c0_78 = arith.constant 0 : index
    %c6 = arith.constant 6 : index
    %c0_79 = arith.constant 0 : index
    %86 = vector.load %arg9[%c0_78, %c6, %c0_79] : memref<2x14x128xf32, #tpu.memory_space<vmem>>, vector<1x8x128xf32>
    %87 = vector.shape_cast %86 : vector<1x8x128xf32> to vector<8x128xf32>
    %c0_80 = arith.constant 0 : index
    %c6_81 = arith.constant 6 : index
    %c0_82 = arith.constant 0 : index
    %c0_83 = arith.constant 0 : index
    %88 = vector.load %arg6[%c0_80, %c6_81, %c0_82, %c0_83] : memref<2x7x128x128xf32, #tpu.memory_space<vmem>>, vector<1x1x128x128xf32>
    %89 = vector.shape_cast %88 : vector<1x1x128x128xf32> to vector<128x128xf32>
    %cst_84 = arith.constant dense<0.000000e+00> : vector<8x128xf32>
    %90 = tpu.matmul %87, %89, %cst_84 {dimension_numbers = #tpu.dot_dimension_numbers<[1], [0], [0], [1], [0, 0, 1, 1], [], []>} : vector<8x128xf32>, vector<128x128xf32>, vector<8x128xf32> -> vector<8x128xf32>
    %91 = arith.addf %67, %90 : vector<8x128xf32>
    %c1_85 = arith.constant 1 : index
    %c0_86 = arith.constant 0 : index
    %c0_87 = arith.constant 0 : index
    %92 = vector.load %arg9[%c1_85, %c0_86, %c0_87] : memref<2x14x128xf32, #tpu.memory_space<vmem>>, vector<1x8x128xf32>
    %93 = vector.shape_cast %92 : vector<1x8x128xf32> to vector<8x128xf32>
    %c1_88 = arith.constant 1 : index
    %c0_89 = arith.constant 0 : index
    %c0_90 = arith.constant 0 : index
    %c0_91 = arith.constant 0 : index
    %94 = vector.load %arg6[%c1_88, %c0_89, %c0_90, %c0_91] : memref<2x7x128x128xf32, #tpu.memory_space<vmem>>, vector<1x1x128x128xf32>
    %95 = vector.shape_cast %94 : vector<1x1x128x128xf32> to vector<128x128xf32>
    %cst_92 = arith.constant dense<0.000000e+00> : vector<8x128xf32>
    %96 = tpu.matmul %93, %95, %cst_92 {dimension_numbers = #tpu.dot_dimension_numbers<[1], [0], [0], [1], [0, 0, 1, 1], [], []>} : vector<8x128xf32>, vector<128x128xf32>, vector<8x128xf32> -> vector<8x128xf32>
    %97 = arith.addf %73, %96 : vector<8x128xf32>
    %c1_93 = arith.constant 1 : index
    %c1_94 = arith.constant 1 : index
    %c0_95 = arith.constant 0 : index
    %98 = vector.load %arg9[%c1_93, %c1_94, %c0_95] : memref<2x14x128xf32, #tpu.memory_space<vmem>>, vector<1x8x128xf32>
    %99 = vector.shape_cast %98 : vector<1x8x128xf32> to vector<8x128xf32>
    %c1_96 = arith.constant 1 : index
    %c1_97 = arith.constant 1 : index
    %c0_98 = arith.constant 0 : index
    %c0_99 = arith.constant 0 : index
    %100 = vector.load %arg6[%c1_96, %c1_97, %c0_98, %c0_99] : memref<2x7x128x128xf32, #tpu.memory_space<vmem>>, vector<1x1x128x128xf32>
    %101 = vector.shape_cast %100 : vector<1x1x128x128xf32> to vector<128x128xf32>
    %cst_100 = arith.constant dense<0.000000e+00> : vector<8x128xf32>
    %102 = tpu.matmul %99, %101, %cst_100 {dimension_numbers = #tpu.dot_dimension_numbers<[1], [0], [0], [1], [0, 0, 1, 1], [], []>} : vector<8x128xf32>, vector<128x128xf32>, vector<8x128xf32> -> vector<8x128xf32>
    %103 = arith.addf %79, %102 : vector<8x128xf32>
    %c1_101 = arith.constant 1 : index
    %c2_102 = arith.constant 2 : index
    %c0_103 = arith.constant 0 : index
    %104 = vector.load %arg9[%c1_101, %c2_102, %c0_103] : memref<2x14x128xf32, #tpu.memory_space<vmem>>, vector<1x8x128xf32>
    %105 = vector.shape_cast %104 : vector<1x8x128xf32> to vector<8x128xf32>
    %c1_104 = arith.constant 1 : index
    %c2_105 = arith.constant 2 : index
    %c0_106 = arith.constant 0 : index
    %c0_107 = arith.constant 0 : index
    %106 = vector.load %arg6[%c1_104, %c2_105, %c0_106, %c0_107] : memref<2x7x128x128xf32, #tpu.memory_space<vmem>>, vector<1x1x128x128xf32>
    %107 = vector.shape_cast %106 : vector<1x1x128x128xf32> to vector<128x128xf32>
    %cst_108 = arith.constant dense<0.000000e+00> : vector<8x128xf32>
    %108 = tpu.matmul %105, %107, %cst_108 {dimension_numbers = #tpu.dot_dimension_numbers<[1], [0], [0], [1], [0, 0, 1, 1], [], []>} : vector<8x128xf32>, vector<128x128xf32>, vector<8x128xf32> -> vector<8x128xf32>
    %109 = arith.addf %85, %108 : vector<8x128xf32>
    %c1_109 = arith.constant 1 : index
    %c3_110 = arith.constant 3 : index
    %c0_111 = arith.constant 0 : index
    %110 = vector.load %arg9[%c1_109, %c3_110, %c0_111] : memref<2x14x128xf32, #tpu.memory_space<vmem>>, vector<1x8x128xf32>
    %111 = vector.shape_cast %110 : vector<1x8x128xf32> to vector<8x128xf32>
    %c1_112 = arith.constant 1 : index
    %c3_113 = arith.constant 3 : index
    %c0_114 = arith.constant 0 : index
    %c0_115 = arith.constant 0 : index
    %112 = vector.load %arg6[%c1_112, %c3_113, %c0_114, %c0_115] : memref<2x7x128x128xf32, #tpu.memory_space<vmem>>, vector<1x1x128x128xf32>
    %113 = vector.shape_cast %112 : vector<1x1x128x128xf32> to vector<128x128xf32>
    %cst_116 = arith.constant dense<0.000000e+00> : vector<8x128xf32>
    %114 = tpu.matmul %111, %113, %cst_116 {dimension_numbers = #tpu.dot_dimension_numbers<[1], [0], [0], [1], [0, 0, 1, 1], [], []>} : vector<8x128xf32>, vector<128x128xf32>, vector<8x128xf32> -> vector<8x128xf32>
    %115 = arith.addf %91, %114 : vector<8x128xf32>
    %c1_117 = arith.constant 1 : index
    %c4_118 = arith.constant 4 : index
    %c0_119 = arith.constant 0 : index
    %116 = vector.load %arg9[%c1_117, %c4_118, %c0_119] : memref<2x14x128xf32, #tpu.memory_space<vmem>>, vector<1x8x128xf32>
    %117 = vector.shape_cast %116 : vector<1x8x128xf32> to vector<8x128xf32>
    %c1_120 = arith.constant 1 : index
    %c4_121 = arith.constant 4 : index
    %c0_122 = arith.constant 0 : index
    %c0_123 = arith.constant 0 : index
    %118 = vector.load %arg6[%c1_120, %c4_121, %c0_122, %c0_123] : memref<2x7x128x128xf32, #tpu.memory_space<vmem>>, vector<1x1x128x128xf32>
    %119 = vector.shape_cast %118 : vector<1x1x128x128xf32> to vector<128x128xf32>
    %cst_124 = arith.constant dense<0.000000e+00> : vector<8x128xf32>
    %120 = tpu.matmul %117, %119, %cst_124 {dimension_numbers = #tpu.dot_dimension_numbers<[1], [0], [0], [1], [0, 0, 1, 1], [], []>} : vector<8x128xf32>, vector<128x128xf32>, vector<8x128xf32> -> vector<8x128xf32>
    %121 = arith.addf %97, %120 : vector<8x128xf32>
    %c1_125 = arith.constant 1 : index
    %c5_126 = arith.constant 5 : index
    %c0_127 = arith.constant 0 : index
    %122 = vector.load %arg9[%c1_125, %c5_126, %c0_127] : memref<2x14x128xf32, #tpu.memory_space<vmem>>, vector<1x8x128xf32>
    %123 = vector.shape_cast %122 : vector<1x8x128xf32> to vector<8x128xf32>
    %c1_128 = arith.constant 1 : index
    %c5_129 = arith.constant 5 : index
    %c0_130 = arith.constant 0 : index
    %c0_131 = arith.constant 0 : index
    %124 = vector.load %arg6[%c1_128, %c5_129, %c0_130, %c0_131] : memref<2x7x128x128xf32, #tpu.memory_space<vmem>>, vector<1x1x128x128xf32>
    %125 = vector.shape_cast %124 : vector<1x1x128x128xf32> to vector<128x128xf32>
    %cst_132 = arith.constant dense<0.000000e+00> : vector<8x128xf32>
    %126 = tpu.matmul %123, %125, %cst_132 {dimension_numbers = #tpu.dot_dimension_numbers<[1], [0], [0], [1], [0, 0, 1, 1], [], []>} : vector<8x128xf32>, vector<128x128xf32>, vector<8x128xf32> -> vector<8x128xf32>
    %127 = arith.addf %103, %126 : vector<8x128xf32>
    %c1_133 = arith.constant 1 : index
    %c6_134 = arith.constant 6 : index
    %c0_135 = arith.constant 0 : index
    %128 = vector.load %arg9[%c1_133, %c6_134, %c0_135] : memref<2x14x128xf32, #tpu.memory_space<vmem>>, vector<1x8x128xf32>
    %129 = vector.shape_cast %128 : vector<1x8x128xf32> to vector<8x128xf32>
    %c1_136 = arith.constant 1 : index
    %c6_137 = arith.constant 6 : index
    %c0_138 = arith.constant 0 : index
    %c0_139 = arith.constant 0 : index
    %130 = vector.load %arg6[%c1_136, %c6_137, %c0_138, %c0_139] : memref<2x7x128x128xf32, #tpu.memory_space<vmem>>, vector<1x1x128x128xf32>
    %131 = vector.shape_cast %130 : vector<1x1x128x128xf32> to vector<128x128xf32>
    %cst_140 = arith.constant dense<0.000000e+00> : vector<8x128xf32>
    %132 = tpu.matmul %129, %131, %cst_140 {dimension_numbers = #tpu.dot_dimension_numbers<[1], [0], [0], [1], [0, 0, 1, 1], [], []>} : vector<8x128xf32>, vector<128x128xf32>, vector<8x128xf32> -> vector<8x128xf32>
    %133 = arith.addf %109, %132 : vector<8x128xf32>
    %134 = arith.addf %127, %133 : vector<8x128xf32>
    %135 = arith.addf %115, %121 : vector<8x128xf32>
    %136 = arith.addf %134, %135 : vector<8x128xf32>
    %137 = arith.negf %136 : vector<8x128xf32>
    %138 = math.exp %137 : vector<8x128xf32>
    %cst_141 = arith.constant 1.000000e+00 : f32
    %139 = vector.broadcast %cst_141 : f32 to vector<8x128xf32>
    %140 = arith.addf %139, %138 : vector<8x128xf32>
    %141 = arith.divf %139, %140 : vector<8x128xf32>
    %142 = vector.shape_cast %141 : vector<8x128xf32> to vector<1x8x128xf32>
    %143 = vector.broadcast %142 : vector<1x8x128xf32> to vector<16x8x128xf32>
    %144 = arith.mulf %30, %143 : vector<16x8x128xf32>
    %c0_142 = arith.constant 0 : index
    %c0_143 = arith.constant 0 : index
    %c0_144 = arith.constant 0 : index
    %c0_145 = arith.constant 0 : index
    %145 = vector.load %arg8[%c0_142, %c0_143, %c0_144, %c0_145] : memref<1x16x8x128xf32, #tpu.memory_space<vmem>>, vector<1x16x8x128xf32>
    %146 = vector.shape_cast %145 : vector<1x16x8x128xf32> to vector<16x8x128xf32>
    %147 = vector.shape_cast %144 : vector<16x8x128xf32> to vector<1x16x8x128xf32>
    tpu.vector_store %arg8[%c0_142, %c0_143, %c0_144, %c0_145], %147 {strides = array<i32>} : memref<1x16x8x128xf32, #tpu.memory_space<vmem>>, vector<1x16x8x128xf32>,
    return
  }
  func.func @transform_0(%arg0: i32) -> (i32, i32, i32, i32) {
    %c0_i32 = arith.constant 0 : i32
    %c0_i32_0 = arith.constant 0 : i32
    %c0_i32_1 = arith.constant 0 : i32
    %c0_i32_2 = arith.constant 0 : i32
    return %arg0, %c0_i32, %c0_i32_0, %c0_i32_1 : i32, i32, i32, i32
  }
  func.func @transform_1(%arg0: i32) -> (i32, i32) {
    %c0_i32 = arith.constant 0 : i32
    %c0_i32_0 = arith.constant 0 : i32
    %c0_i32_1 = arith.constant 0 : i32
    return %c0_i32, %c0_i32_0 : i32, i32
  }
  func.func @transform_2(%arg0: i32) -> (i32, i32) {
    %c0_i32 = arith.constant 0 : i32
    %c0_i32_0 = arith.constant 0 : i32
    %c0_i32_1 = arith.constant 0 : i32
    return %c0_i32, %c0_i32_0 : i32, i32
  }
  func.func @transform_3(%arg0: i32) -> (i32, i32) {
    %c0_i32 = arith.constant 0 : i32
    %c0_i32_0 = arith.constant 0 : i32
    %c0_i32_1 = arith.constant 0 : i32
    return %c0_i32, %c0_i32_0 : i32, i32
  }
  func.func @transform_4(%arg0: i32) -> (i32, i32) {
    %c0_i32 = arith.constant 0 : i32
    %c0_i32_0 = arith.constant 0 : i32
    %c0_i32_1 = arith.constant 0 : i32
    return %c0_i32, %c0_i32_0 : i32, i32
  }
  func.func @transform_5(%arg0: i32) -> (i32, i32, i32, i32) {
    %c0_i32 = arith.constant 0 : i32
    %c0_i32_0 = arith.constant 0 : i32
    %c0_i32_1 = arith.constant 0 : i32
    %c0_i32_2 = arith.constant 0 : i32
    %c0_i32_3 = arith.constant 0 : i32
    return %c0_i32, %c0_i32_0, %c0_i32_1, %c0_i32_2 : i32, i32, i32, i32
  }
  func.func @transform_6(%arg0: i32) -> i32 {
    %c0_i32 = arith.constant 0 : i32
    %c0_i32_0 = arith.constant 0 : i32
    return %c0_i32 : i32
  }
  func.func @transform_7(%arg0: i32) -> (i32, i32, i32, i32) {
    %c0_i32 = arith.constant 0 : i32
    %c0_i32_0 = arith.constant 0 : i32
    %c0_i32_1 = arith.constant 0 : i32
    %c0_i32_2 = arith.constant 0 : i32
    return %arg0, %c0_i32, %c0_i32_0, %c0_i32_1 : i32, i32, i32, i32
  }
}

</mosaic_0001>

<bundles_post_ra>
// kernel: tpu_custom_call.1
= control target key start
LH: loop header
LB: loop body
LE: loop exit
PB: predicated region body
PF: predicated region fallthrough
CT: control target
= control target key end

     0   :  { %s2019_s0 = inlined_call_operand.hbm [shape: f32[2,16,8,128], index: 0, kind: input, shape index: {}]   ;;  %s2020_s1 = inlined_call_operand.vmem [shape: f32[16,2], index: 1, kind: input, shape index: {}]   ;;  %s2021_s2 = inlined_call_operand.vmem [shape: f32[1,2], index: 2, kind: input, shape index: {}]   ;;  %s2022_s3 = inlined_call_operand.vmem [shape: f32[16,2], index: 3, kind: input, shape index: {}]   ;;  %s2023_s4 = inlined_call_operand.vmem [shape: f32[16,1], index: 4, kind: input, shape index: {}]   ;;  %s2024_s5 = inlined_call_operand.hbm [shape: f32[2,7,128,128], index: 5, kind: input, shape index: {}]   ;;  %s2025_s6 = inlined_call_operand.<no memory space> [shape: f32[1], index: 6, kind: input, shape index: {}]   ;;  %s2026_s7 = inlined_call_operand.hbm [shape: f32[2,16,8,128], index: 7, kind: output, shape index: {}]  }
   0x1   :  { %12 = sst [smem:[#allocation3]] %s2025_s6 }
   0x2   :  { %13 = vsyncpa [#allocation5], 0 }
   0x3   :  { %15 = vsyncpa [#allocation5 + $0x1], 0 }
   0x4   :  { %16 = vsyncpa [#allocation8], 0 }
   0x5   :  { %17 = vsyncpa [#allocation6], 0 }
   0x6   :  { %19 = vsyncpa [#allocation6 + $0x1], 0  ;;  %s1627_s26 = smov 0   ;;  %s1629_s27 = smov 0  }
   0x7   :  { %s1631_s28 = smov 0   ;;  %s1633_s29 = smov 0  }
   0x8 LB: > { %s1648_s6 = sadd.s32 4294967295, %s1575_s29   ;;  %s1346_s30 = sadd.s32 4294967294, %s1575_s29   ;;  %s1575_s29 = sphi %s1633_s29, %s2040_s29   ;;  %s1571_s28 = sphi %s1631_s28, %s2039_s28   ;;  %s1567_s27 = sphi %s1629_s27, %s2038_s27   ;;  %s1563_s26 = sphi %s1627_s26, %s2037_s26  }
   0x9   : > { %p45_p0 = scmp.ne.s32.totalorder %s1567_s27, %s1563_s26  ;;  %p46_p1 = scmp.eq.s32.totalorder %s1648_s6, 0 }
   0xa   : > { %p195_p2 = scmp.eq.s32.totalorder %s1648_s6, 1  ;;  %p201_p3 = scmp.eq.s32.totalorder %s1346_s30, 1 }
   0xb   : > { %p1657_p4 = por %p46_p1, %p45_p0  ;;  %p1347_p5 = scmp.ge.s32.totalorder %s1575_s29, 1 }
   0xc   : > { %p1662_p6 = por %p201_p3, %p45_p0  ;;  %p208_p7 = scmp.lt.s32.totalorder %s1575_s29, 3 }
   0xd   : > { %s231_s12 = sshll.u32 %s2024_s5, 4  ;;  %s1577_s14 = smov [#allocation7]   ;;  %s232_s12 = int_to_ptr.hbm [resolvable:$true] %s231_s12 }
   0xe   : > { %p1670_p8 = pnand %p1347_p5, %p208_p7  ;;  %s233_s15 = sshll.u32 %s1577_s14, 4  ;;  %s234_s15 = int_to_ptr.vmem [resolvable:$true] %s233_s15 }
   0xf   : > { %s1680_s16 = sadd.s32 1, %s1575_s29   ;;  %s2027_s17 = smov 128  }
  0x10   : > { %p1375_p9 = pneg %p1670_p8  ;;  %s2028_s18 = smov 8  }
  0x11   : > { %s29_s19 = ssub.s32 %s1575_s29, %s1680_s16  ;;  %s32_s20 = sadd.s32 1, %s1571_s28 }
  0x12   : > { %p1376_p10 = pnand %p1375_p9, %p46_p1  ;;  %p30_p12 = scmp.eq.s32.totalorder %s29_s19, 0 }
  0x13   : > { %p39_p13 = scmp.ne.s32.totalorder %s1571_s28, %s1567_s27  ;;  %p40_p0 = scmp.eq.s32.totalorder %s1575_s29, 0 }
  0x14   : > { %1378 = dma.hbm_to_vmem [thread:$0]  (!%p1376_p10), %s232_s12, 28672, %s234_s15, [#allocation8], %s2027_s17, %s2027_s17, %s2028_s18  }
  0x15   : > { %s1692_s21 = scalar_select %p30_p12, %s1571_s28, %s32_s20  }
  0x16   : > { %p1696_p3 = por %p195_p2, %p39_p13  ;;  %p1388_p5 = scmp.lt.s32.totalorder %s1575_s29, 2 }
  0x17   : > { %s250_s23 = sand.u32 1, %s1571_s28   ;;  %s1365_s24 = sshll.u32 %s1575_s29, 7 }
  0x18   : > { %p41_p7 = por %p40_p0, %p39_p13  ;;  %s1350_s25 = sshll.u32 %s250_s23, 7 }
  0x19   : > { %s259_s11 = scalar_lea.hbm %s2019_s0, %s1365_s24  ;;  %s254_s14 = scalar_lea.vmem [#allocation4], %s1350_s25 }
  0x1a   : > { %s260_s12 = sshll.u32 %s259_s11, 4  ;;  %s262_s15 = sshll.u32 %s254_s14, 4  ;;  %s261_s12 = int_to_ptr.hbm [resolvable:$true] %s260_s12  ;;  %s263_s15 = int_to_ptr.vmem [resolvable:$true] %s262_s15 }
  0x1b   : > { %p1706_p9 = pnand %p1388_p5, %p41_p7  ;;  %s251_s20 = scalar_lea.sflag [#allocation5], %s250_s23 }
  0x1c   : > { %s1475_s17 = sshra.s32 %s261_s12, 4  ;;  %s1482_s25 = scalar_lea.hbm %s2019_s0, 256  ;;  %s1476_s17 = int_to_ptr.hbm [resolvable:$true] %s1475_s17 }
  0x1d   : > { %s1477_s18 = scalar_lea.hbm %s1476_s17, 128  ;;  %p1479_p10 = pneg %p1706_p9 }
  0x1e   : > { %p1478_p2 = scmp.ne.s32.totalorder %s1476_s17, %s1477_s18  ;;  %p1483_p0 = scmp.lt.s32.totalorder %s1476_s17, %s2019_s0 }
  0x1f   : > { %p1484_p5 = scmp.lt.s32.totalorder %s1482_s25, %s1477_s18 }
  0x20   : > { %p1480_p12 = pnand %p1479_p10, %p1478_p2 }
  0x21   : > { %p1485_p7 = por %p1484_p5, %p1483_p0 }
  0x22   : > { %p1481_p13 = pneg %p1480_p12 }
  0x24   : > { %p1486_p11 = pnand %p1485_p7, %p1481_p13 }
  0x26   : > { %1489 = shalt.err (!%p1486_p11)
}
  0x27   : > { %s2034_s23 = smov 8   ;;  %s2035_s14 = smov 128  }
  0x28   : > { %1382 = dma.hbm_to_vmem [thread:$0]  (!%p1706_p9), %s261_s12, 2048, %s263_s15, %s251_s20, %s2035_s14, %s2035_s14, %s2034_s23  }
  0x29   : > { %274 = sbr.rel (%p1670_p8) target bundleno = 920 (0x398), region = 48  ;;  %s1726_s24 = sand.u32 (!%p1670_p8), 1, %s1567_s27  }
  0x2a   : > { %s1354_s17 = sshll.u32 (!%p1670_p8), %s1726_s24, 7  ;;  %s277_s18 = scalar_lea.sflag (!%p1670_p8), [#allocation5], %s1726_s24 }
  0x2b   : > { %s1732_s30 = scalar_lea.vmem (!%p1670_p8), [#allocation4], %s1354_s17 }
  0x2e   : > { %1550 = dma.done.wait (%p1657_p4), %s277_s18, 2048  }
  0x2f   : > { %1552 = vsyncadd (%p1657_p4), %s277_s18, 4294965248 }
  0x30   : > { %1554 = dma.done.wait (%p46_p1), [#allocation8], 28672  }
  0x31   : > { %1556 = vsyncadd (%p46_p1), [#allocation8], 4294938624  ;;  %v1743_v0 = vld [vmem:[%s1732_s30 + $0x40] sm:$0xff]  ;;  %v1749_v2 = vld [vmem:[%s1732_s30 + $0x10] sm:$0xff]  ;;  %v381_v22 = vlaneseq  ;;  %vm399_vm0 = vcmask 1041409   ;;  %vm401_vm1 = vcmask 1042434  }
  0x32   : > { %v1746_v1 = vld [vmem:[%s1732_s30] sm:$0xff]  ;;  %349 = vadd.xlane.f32.xlu1 %v1743_v0  ;;  %337 = vadd.xlane.f32.xlu2 %v1749_v2  ;;  %v1755_v3 = vld [vmem:[%s1732_s30 + $0x48] sm:$0xff]  ;;  %v1761_v5 = vld [vmem:[%s1732_s30 + $0x50] sm:$0xff]  ;;  %vm403_vm2 = vcmask 1043459   ;;  %vm405_vm3 = vcmask 1044484   ;;  %vm407_vm4 = vcmask 1045509  }
  0x33   : > { %333 = vadd.xlane.f32.xlu0 %v1746_v1  ;;  %v1758_v4 = vld [vmem:[%s1732_s30 + $0x8] sm:$0xff]  ;;  %v1767_v6 = vld [vmem:[%s1732_s30 + $0x58] sm:$0xff]  ;;  %v1773_v8 = vld [vmem:[%s1732_s30 + $0x20] sm:$0xff]  ;;  %v382_v26 = vand.u32 127, %v381_v22  ;;  %vm409_vm5 = vcmask 1046534   ;;  %vm411_vm6 = vcmask 1047559  }
  0x34   : > { %v1770_v7 = vld [vmem:[%s1732_s30 + $0x18] sm:$0xff]  ;;  %v1779_v9 = vld [vmem:[%s1732_s30 + $0x28] sm:$0xff]  ;;  %v1782_v10 = vld [vmem:[%s1732_s30 + $0x60] sm:$0xff]  ;;  %vm422_vm7 = vcmask 64512   ;;  %vm435_vm8 = vcmask 15360   ;;  %s651_s13 = sld [smem:[#allocation3]] }
  0x35   : > { %v1785_v11 = vld [vmem:[%s1732_s30 + $0x68] sm:$0xff]  ;;  %v1791_v12 = vld [vmem:[%s1732_s30 + $0x70] sm:$0xff]  ;;  %v1797_v14 = vld [vmem:[%s1732_s30 + $0x38] sm:$0xff]  ;;  %s1956_s12 = scalar_lea.vmem [#allocation9], %s1354_s17  ;;  %s1366_s17 = sshll.u32 %s1648_s6, 7 }
  0x36   : > { %v1794_v13 = vld [vmem:[%s1732_s30 + $0x30] sm:$0xff]  ;;  %v1803_v15 = vld [vmem:[%s1732_s30 + $0x78] sm:$0xff]  ;;  %s1259_s20 = scalar_lea.hbm %s2026_s7, %s1366_s17  ;;  %s1260_s6 = sshll.u32 %s1956_s12, 4  ;;  %s1261_s6 = int_to_ptr.vmem [resolvable:$true] %s1260_s6 }
  0x37   : > { %s1262_s25 = sshll.u32 %s1259_s20, 4  ;;  %s1248_s10 = scalar_lea.sflag [#allocation6], %s1726_s24  ;;  %s1263_s25 = int_to_ptr.hbm [resolvable:$true] %s1262_s25 }
  0x38   : > { %s1519_s11 = sshra.s32 %s1263_s25, 4  ;;  %s1525_s30 = scalar_lea.hbm %s2026_s7, 256  ;;  %s1520_s11 = int_to_ptr.hbm [resolvable:$true] %s1519_s11 }
  0x39   : > { %s1521_s23 = scalar_lea.hbm %s1520_s11, 128  ;;  %p1526_p11 = scmp.lt.s32.totalorder %s1520_s11, %s2026_s7 }
  0x3a   : > { %351 = vadd.xlane.f32.xlu1 %v1755_v3  ;;  %353 = vadd.xlane.f32.xlu2 %v1761_v5  ;;  %p1522_p1 = scmp.ne.s32.totalorder %s1520_s11, %s1521_s23  ;;  %p1527_p9 = scmp.lt.s32.totalorder %s1525_s30, %s1521_s23 }
  0x3b   : > { %335 = vadd.xlane.f32.xlu0 %v1758_v4 }
  0x3c   : > { %p1523_p4 = pnand %p1522_p1, %p1696_p3  ;;  %p1528_p2 = por %p1527_p9, %p1526_p11 }
  0x3e   : > { %p1524_p8 = pneg %p1523_p4 }
  0x40   : > { %p1529_p10 = pnand %p1528_p2, %p1524_p8 }
  0x42   : > { %355 = vadd.xlane.f32.xlu1 %v1767_v6  ;;  %341 = vadd.xlane.f32.xlu2 %v1773_v8 }
  0x43   : > { %339 = vadd.xlane.f32.xlu0 %v1770_v7 }
  0x4a   : > { %343 = vadd.xlane.f32.xlu1 %v1779_v9  ;;  %359 = vadd.xlane.f32.xlu2 %v1785_v11 }
  0x4b   : > { %357 = vadd.xlane.f32.xlu0 %v1782_v10 }
  0x52   : > { %361 = vadd.xlane.f32.xlu1 %v1791_v12  ;;  %347 = vadd.xlane.f32.xlu2 %v1797_v14 }
  0x53   : > { %345 = vadd.xlane.f32.xlu0 %v1794_v13 }
  0x5b   : > { %363 = vadd.xlane.f32.xlu0 %v1803_v15 }
  0xa5   : > { %v350_v16 = vpop.xlane.xlu1 %349  ;;  %v338_v18 = vpop.xlane.xlu2 %337 }
  0xa6   : > { %v334_v17 = vpop.xlane.xlu0 %333  ;;  %v385_v30 = vperm.slane %v338_v18, %v382_v26  ;;  %v391_v35 = vperm.slane %v350_v16, %v382_v26 }
  0xa7   : > { %v383_v28 = vperm.slane %v334_v17, %v382_v26 }
  0xad   : > { %v352_v19 = vpop.xlane.xlu1 %351  ;;  %v354_v21 = vpop.xlane.xlu2 %353 }
  0xae   : > { %v336_v20 = vpop.xlane.xlu0 %335  ;;  %v392_v36 = vperm.slane %v352_v19, %v382_v26  ;;  %v393_v41 = vperm.slane %v354_v21, %v382_v26  ;;  %v432_v21 = vld [vmem:[%s2020_s1 + $0x8] sm:$0xff] }
  0xaf   : > { %v384_v27 = vperm.slane %v336_v20, %v382_v26  ;;  %v431_v20 = vld [vmem:[%s2020_s1] sm:$0xff] }
  0xb0   : > { %v413_v43 = vsel %vm399_vm0, %v392_v36, %v391_v35 }
  0xb1   : > { %v400_v33 = vsel %vm399_vm0, %v384_v27, %v383_v28  ;;  %v414_v53 = vsel %vm401_vm1, %v393_v41, %v413_v43 }
  0xb2   : > { %v402_v37 = vsel %vm401_vm1, %v385_v30, %v400_v33 }
  0xb5   : > { %v356_v23 = vpop.xlane.xlu1 %355  ;;  %v342_v25 = vpop.xlane.xlu2 %341 }
  0xb6   : > { %v340_v24 = vpop.xlane.xlu0 %339  ;;  %v387_v38 = vperm.slane %v342_v25, %v382_v26  ;;  %v394_v44 = vperm.slane %v356_v23, %v382_v26 }
  0xb7   : > { %v386_v34 = vperm.slane %v340_v24, %v382_v26 }
  0xb8   : > { %v415_v55 = vsel %vm403_vm2, %v394_v44, %v414_v53 }
  0xb9   : > { %v404_v39 = vsel %vm403_vm2, %v386_v34, %v402_v37  ;;  %v445_v34 = vld [vmem:[%s2021_s2] sm:$0x1] }
  0xba   : > { %v406_v45 = vsel %vm405_vm3, %v387_v38, %v404_v39  ;;  %v449_v38 = vld [vmem:[%s2022_s3 + $0x8] sm:$0xff]  ;;  %v448_v39 = vld [vmem:[%s2022_s3] sm:$0xff] }
  0xbd   : > { %v344_v31 = vpop.xlane.xlu1 %343  ;;  %v360_v32 = vpop.xlane.xlu2 %359 }
  0xbe   : > { %v358_v29 = vpop.xlane.xlu0 %357  ;;  %v388_v40 = vperm.slane %v344_v31, %v382_v26  ;;  %v396_v56 = vperm.slane %v360_v32, %v382_v26 }
  0xbf   : > { %v395_v49 = vperm.slane %v358_v29, %v382_v26 }
  0xc0   : > { %v408_v48 = vsel %vm407_vm4, %v388_v40, %v406_v45  ;;  %v460_v45 = vld [vmem:[%s2023_s4 + $0x8] sm:$0xff] }
  0xc1   : > { %v416_v58 = vsel %vm405_vm3, %v395_v49, %v415_v55  ;;  %v1580_v49 = vmov 0  }
  0xc2   : > { %v417_v61 = vsel %vm407_vm4, %v396_v56, %v416_v58  ;;  %1431 = vset.pattern.permute.xlu0 %v1580_v49  ;;  %1430 = vset.pattern.permute.xlu2 %v1580_v49 }
  0xc3   : > { %1432 = vset.pattern.permute.xlu1 %v1580_v49 }
  0xc5   : > { %v348_v47 = vpop.xlane.xlu2 %347  ;;  %v362_v51 = vpop.xlane.xlu1 %361 }
  0xc6   : > { %v346_v42 = vpop.xlane.xlu0 %345  ;;  %v390_v50 = vperm.slane %v348_v47, %v382_v26  ;;  %v397_v59 = vperm.slane %v362_v51, %v382_v26 }
  0xc7   : > { %v389_v46 = vperm.slane %v346_v42, %v382_v26 }
  0xc8   : > { %v418_v63 = vsel %vm409_vm5, %v397_v59, %v417_v61 }
  0xc9   : > { %v410_v52 = vsel %vm409_vm5, %v389_v46, %v408_v48  ;;  %v459_v46 = vld [vmem:[%s2023_s4] sm:$0xff] }
  0xca   : > { %v412_v54 = vsel %vm411_vm6, %v390_v50, %v410_v52 }
  0xcb   : > { %v423_v57 = vsel %vm422_vm7, %v412_v54, 0.0 }
  0xcc   : > { %424 = vadd.xlane.f32.xlu1 %v423_v57 }
  0xce   : > { %v364_v60 = vpop.xlane.xlu0 %363 }
  0xcf   : > { %v398_v62 = vperm.slane %v364_v60, %v382_v26 }
  0xd1   : > { %v419_v16 = vsel %vm411_vm6, %v398_v62, %v418_v63 }
  0xd2   : > { %v426_v17 = vsel %vm422_vm7, %v419_v16, 0.0 }
  0xd3   : > { %427 = vadd.xlane.f32.xlu2 %v426_v17 }
 0x13f   : > { %v425_v18 = vpop.xlane.xlu1 %424 }
 0x140   : > { %v429_v19 = vmul.f32 0.0009765625, %v425_v18 }
 0x142   : > { %v433_v23 = vmul.f32 %v431_v20, %v429_v19 }
 0x144   : > { %v436_v26 = vsel %vm435_vm8, %v433_v23, 0.0 }
 0x146   : > { %v428_v22 = vpop.xlane.xlu2 %427 }
 0x147   : > { %v430_v24 = vmul.f32 0.0009765625, %v428_v22 }
 0x149   : > { %v434_v25 = vmul.f32 %v432_v21, %v430_v24 }
 0x14b   : > { %v437_v27 = vsel %vm435_vm8, %v434_v25, 0.0 }
 0x14c   : > { %v438_v28 = vadd.f32 %v437_v27, %v436_v26 }
 0x14e   : > { %v439_v29 = vrot.slane %v438_v28, 4 }
 0x150   : > { %v440_v30 = vadd.f32 %v439_v29, %v438_v28 }
 0x152   : > { %v441_v31 = vrot.slane %v440_v30, 2 }
 0x154   : > { %v442_v32 = vadd.f32 %v441_v31, %v440_v30 }
 0x156   : > { %v443_v33 = vrot.slane %v442_v32, 1 }
 0x158   : > { %v444_v35 = vadd.f32 %v443_v33, %v442_v32 }
 0x15a   : > { %v446_v36 = vadd.f32 %v445_v34, %v444_v35 }
 0x15c   : > { %v447_v37 = vmax.f32 %v446_v36, 0.0 }
 0x15e   : > { %v450_v40 = vperm.slane %v447_v37, 0 }
 0x160   : > { %v452_v41 = vmul.f32 %v450_v40, %v449_v38  ;;  %v451_v42 = vmul.f32 %v450_v40, %v448_v39 }
 0x162   : > { %v456_v43 = vsel %vm435_vm8, %v452_v41, 0.0  ;;  %v453_v44 = vsel %vm435_vm8, %v451_v42, 0.0 }
 0x163   : > { %457 = vadd.xlane.f32.xlu1 %v456_v43  ;;  %454 = vadd.xlane.f32.xlu0 %v453_v44 }
 0x1d6   : > { %v458_v47 = vpop.xlane.xlu1 %457  ;;  %v455_v48 = vpop.xlane.xlu0 %454 }
 0x1d7   : > { %v462_v50 = vadd.f32 %v460_v45, %v458_v47  ;;  %v461_v51 = vadd.f32 %v459_v46, %v455_v48 }
 0x1d9   : > { %v1358_v52 = vmul.f32 -1.442695, %v462_v50  ;;  %v1357_v53 = vmul.f32 -1.442695, %v461_v51 }
 0x1db   : > { %1433 = vpow2.f32 %v1358_v52 }
 0x1dc   : > { %1435 = vpow2.f32 %v1357_v53 }
 0x1e1   : > { %v1434_v54 = vpop.eup %1433 }
 0x1e2   : > { %v1436_v55 = vpop.eup %1435  ;;  %v470_v56 = vadd.f32 1.0, %v1434_v54 }
 0x1e3   : > { %v469_v57 = vadd.f32 1.0, %v1436_v55 }
 0x1e4   : > { %1437 = vrcp.f32 %v470_v56  ;;  %v497_v63 = vand.u32 2147483648, %v470_v56  ;;  %v495_v18 = vand.u32 2147483647, %v470_v56  ;;  %vm491_vm11 = vweird.f32 %v470_v56 }
 0x1e5   : > { %1439 = vrcp.f32 %v469_v57  ;;  %v482_v19 = vand.u32 2147483648, %v469_v57  ;;  %v480_v21 = vand.u32 2147483647, %v469_v57  ;;  %vm476_vm13 = vweird.f32 %v469_v57 }
 0x1e6   : > { %v498_v23 = vor.u32 1.1754944e-38, %v497_v63  ;;  %vm496_vm14 = vcmp.eq.f32.partialorder %v495_v18, 8.507059e+37  ;;  %v709_v63 = vld [vmem:[#allocation7 + $0xf8] sm:$0xff]  ;;  %v801_v18 = vld [vmem:[#allocation7 + $0x2f0] sm:$0xff] }
 0x1e7   : > { %v483_v26 = vor.u32 1.1754944e-38, %v482_v19  ;;  %vm481_vm0 = vcmp.eq.f32.partialorder %v480_v21, 8.507059e+37  ;;  %823 = vmatpush.msra.mxu3 %v709_v63  ;;  %v708_v19 = vld [vmem:[#allocation7 + $0xf0] sm:$0xff]  ;;  %v761_v21 = vld [vmem:[#allocation7 + $0x268] sm:$0xff]  ;;  %v751_v63 = vld [vmem:[#allocation7 + $0x218] sm:$0xff] }
 0x1e9   : > { %824 = vmatpush.msra.mxu3 %v708_v19  ;;  %v750_v19 = vld [vmem:[#allocation7 + $0x210] sm:$0xff] }
 0x1ea   : > { %v1438_v58 = vpop.eup %1437 }
 0x1eb   : > { %v1440_v59 = vpop.eup %1439  ;;  %v487_v60 = vmul.f32 %v1438_v58, %v470_v56  ;;  %vm492_vm9 = vweird.f32 %v1438_v58 }
 0x1ec   : > { %v472_v61 = vmul.f32 %v1440_v59, %v469_v57  ;;  %vm477_vm10 = vweird.f32 %v1440_v59  ;;  %vm493_vm12 = vmor %vm491_vm11, %vm492_vm9 }
 0x1ed   : > { %v488_v62 = vsub.f32 1.0, %v487_v60  ;;  %vm478_vm15 = vmor %vm476_vm13, %vm477_vm10  ;;  %v670_v60 = vld [vmem:[#allocation7 + $0x78] sm:$0xff] }
 0x1ee   : > { %v473_v16 = vsub.f32 1.0, %v472_v61  ;;  %v763_v61 = vld [vmem:[#allocation7 + $0x278] sm:$0xff]  ;;  %671 = vmatpush.msra.mxu0 %v670_v60 }
 0x1ef   : > { %v489_v17 = vmul.f32 %v1438_v58, %v488_v62  ;;  %v802_v62 = vld [vmem:[#allocation7 + $0x2f8] sm:$0xff]  ;;  %764 = vmatpush.msra.mxu1 %v763_v61  ;;  %v698_v61 = vld [vmem:[#allocation7 + $0xa0] sm:$0xff] }
 0x1f0   : > { %v474_v20 = vmul.f32 %v1440_v59, %v473_v16  ;;  %v669_v16 = vld [vmem:[#allocation7 + $0x70] sm:$0xff]  ;;  %803 = vmatpush.msra.mxu2 %v802_v62  ;;  %v658_v62 = vld [vmem:[#allocation7 + $0x18] sm:$0xff] }
 0x1f1   : > { %v490_v22 = vadd.f32 %v1438_v58, %v489_v17  ;;  %v762_v17 = vld [vmem:[#allocation7 + $0x270] sm:$0xff]  ;;  %672 = vmatpush.msra.mxu0 %v669_v16  ;;  %v790_v16 = vld [vmem:[#allocation7 + $0x298] sm:$0xff] }
 0x1f2   : > { %v475_v24 = vadd.f32 %v1440_v59, %v474_v20  ;;  %765 = vmatpush.msra.mxu1 %v762_v17  ;;  %804 = vmatpush.msra.mxu2 %v801_v18  ;;  %v668_v20 = vld [vmem:[#allocation7 + $0x68] sm:$0xff]  ;;  %v697_v17 = vld [vmem:[#allocation7 + $0x98] sm:$0xff]  ;;  %v657_v18 = vld [vmem:[#allocation7 + $0x10] sm:$0xff] }
 0x1f3   : > { %v494_v25 = vsel %vm493_vm12, %v1438_v58, %v490_v22  ;;  %v800_v22 = vld [vmem:[#allocation7 + $0x2e8] sm:$0xff]  ;;  %673 = vmatpush.msra.mxu0 %v668_v20  ;;  %v789_v20 = vld [vmem:[#allocation7 + $0x290] sm:$0xff] }
 0x1f4   : > { %v499_v27 = vsel %vm496_vm14, %v498_v23, %v494_v25  ;;  %v479_v28 = vsel %vm478_vm15, %v1440_v59, %v475_v24  ;;  %766 = vmatpush.msra.mxu1 %v761_v21  ;;  %v707_v23 = vld [vmem:[#allocation7 + $0xe8] sm:$0xff]  ;;  %v667_v24 = vld [vmem:[#allocation7 + $0x60] sm:$0xff]  ;;  %805 = vmatpush.msra.mxu2 %v800_v22  ;;  %v696_v21 = vld [vmem:[#allocation7 + $0x90] sm:$0xff] }
 0x1f5   : > { %v484_v29 = vsel %vm481_vm0, %v483_v26, %v479_v28  ;;  %v525_v30 = vperm.slane %v499_v27, 0  ;;  %v512_v40 = vrot.slane %v499_v27, 3  ;;  %v515_v46 = vrot.slane %v499_v27, 6  ;;  %v760_v25 = vld [vmem:[#allocation7 + $0x260] sm:$0xff]  ;;  %825 = vmatpush.msra.mxu3 %v707_v23  ;;  %v666_v28 = vld [vmem:[#allocation7 + $0x58] sm:$0xff]  ;;  %674 = vmatpush.msra.mxu0 %v667_v24  ;;  %v656_v22 = vld [vmem:[#allocation7 + $0x8] sm:$0xff] }
 0x1f6   : > { %v517_v31 = vperm.slane %v484_v29, 0  ;;  %v504_v32 = vrot.slane %v484_v29, 2  ;;  %v503_v34 = vrot.slane %v484_v29, 1  ;;  %v505_v35 = vrot.slane %v484_v29, 3  ;;  %v799_v26 = vld [vmem:[#allocation7 + $0x2e0] sm:$0xff]  ;;  %767 = vmatpush.msra.mxu1 %v760_v25  ;;  %v749_v23 = vld [vmem:[#allocation7 + $0x208] sm:$0xff] }
 0x1f7   : > { %566 = vperm.xlu0 %1431, %v525_v30   ;;  %v507_v36 = vrot.slane %v484_v29, 5  ;;  %v506_v41 = vrot.slane %v484_v29, 4  ;;  %v509_v42 = vrot.slane %v484_v29, 7  ;;  %v528_v43 = vperm.slane %v512_v40, 0  ;;  %v798_v30 = vld [vmem:[#allocation7 + $0x2d8] sm:$0xff]  ;;  %806 = vmatpush.msra.mxu2 %v799_v26  ;;  %v663_v40 = vld [vmem:[#allocation7 + $0x40] sm:$0xff] }
 0x1f8   : > { %534 = vperm.xlu2 %1430, %v517_v31   ;;  %v519_v33 = vperm.slane %v504_v32, 0  ;;  %v518_v37 = vperm.slane %v503_v34, 0  ;;  %v520_v38 = vperm.slane %v505_v35, 0  ;;  %v508_v47 = vrot.slane %v484_v29, 6  ;;  %v759_v29 = vld [vmem:[#allocation7 + $0x258] sm:$0xff]  ;;  %v665_v32 = vld [vmem:[#allocation7 + $0x50] sm:$0xff]  ;;  %675 = vmatpush.msra.mxu0 %v666_v28 }
 0x1f9   : > { %v522_v39 = vperm.slane %v507_v36, 0  ;;  %v521_v44 = vperm.slane %v506_v41, 0  ;;  %v524_v45 = vperm.slane %v509_v42, 0  ;;  %v511_v48 = vrot.slane %v499_v27, 2  ;;  %v705_v31 = vld [vmem:[#allocation7 + $0xd8] sm:$0xff]  ;;  %768 = vmatpush.msra.mxu1 %v759_v29  ;;  %v797_v34 = vld [vmem:[#allocation7 + $0x2d0] sm:$0xff]  ;;  %807 = vmatpush.msra.mxu2 %v798_v30 }
 0x1fa   : > { %542 = vperm.xlu1 %1432, %v519_v33   ;;  %v531_v49 = vperm.slane %v515_v46, 0  ;;  %v523_v50 = vperm.slane %v508_v47, 0  ;;  %v510_v52 = vrot.slane %v499_v27, 1  ;;  %v514_v53 = vrot.slane %v499_v27, 5  ;;  %v758_v33 = vld [vmem:[#allocation7 + $0x250] sm:$0xff]  ;;  %676 = vmatpush.msra.mxu0 %v665_v32  ;;  %v664_v36 = vld [vmem:[#allocation7 + $0x48] sm:$0xff] }
 0x1fb   : > { %v527_v51 = vperm.slane %v511_v48, 0  ;;  %v513_v56 = vrot.slane %v499_v27, 4  ;;  %v516_v58 = vrot.slane %v499_v27, 7  ;;  %v706_v27 = vld [vmem:[#allocation7 + $0xe0] sm:$0xff]  ;;  %v704_v35 = vld [vmem:[#allocation7 + $0xd0] sm:$0xff]  ;;  %769 = vmatpush.msra.mxu1 %v758_v33  ;;  %808 = vmatpush.msra.mxu2 %v797_v34  ;;  %v794_v46 = vld [vmem:[#allocation7 + $0x2b8] sm:$0xff] }
 0x1fc   : > { %v526_v54 = vperm.slane %v510_v52, 0  ;;  %v530_v55 = vperm.slane %v514_v53, 0  ;;  %826 = vmatpush.msra.mxu3 %v706_v27  ;;  %677 = vmatpush.msra.mxu0 %v664_v36  ;;  %v756_v41 = vld [vmem:[#allocation7 + $0x240] sm:$0xff]  ;;  %v701_v47 = vld [vmem:[#allocation7 + $0xb8] sm:$0xff]  ;;  %v661_v48 = vld [vmem:[#allocation7 + $0x30] sm:$0xff] }
 0x1fd   : > { %v529_v57 = vperm.slane %v513_v56, 0  ;;  %v532_v59 = vperm.slane %v516_v58, 0  ;;  %v795_v42 = vld [vmem:[#allocation7 + $0x2c0] sm:$0xff]  ;;  %v700_v52 = vld [vmem:[#allocation7 + $0xb0] sm:$0xff]  ;;  %v660_v53 = vld [vmem:[#allocation7 + $0x28] sm:$0xff] }
 0x1fe   : > { %827 = vmatpush.msra.mxu3 %v705_v31  ;;  %678 = vmatpush.msra.mxu0 %v663_v40  ;;  %v699_v56 = vld [vmem:[#allocation7 + $0xa8] sm:$0xff]  ;;  %v752_v58 = vld [vmem:[#allocation7 + $0x220] sm:$0xff]  ;;  %v860_v31 = vld [vmem:[#allocation7 + $0x378] sm:$0xff] }
 0x1ff   : > { %538 = vperm.xlu0 %1431, %v518_v37   ;;  %v757_v37 = vld [vmem:[#allocation7 + $0x248] sm:$0xff]  ;;  %v655_v26 = vld [vmem:[#allocation7] sm:$0xff]  ;;  %v727_v32 = vld [vmem:[#allocation7 + $0x178] sm:$0xff] }
 0x200   : > { %546 = vperm.xlu2 %1430, %v520_v38   ;;  %v796_v38 = vld [vmem:[#allocation7 + $0x2c8] sm:$0xff]  ;;  %828 = vmatpush.msra.mxu3 %v704_v35  ;;  %v748_v27 = vld [vmem:[#allocation7 + $0x200] sm:$0xff]  ;;  %v918_v33 = vld [vmem:[#allocation7 + $0x3f8] sm:$0xff] }
 0x201   : > { %770 = vmatpush.msra.mxu1 %v757_v37  ;;  %809 = vmatpush.msra.mxu2 %v796_v38  ;;  %v788_v24 = vld [vmem:[#allocation7 + $0x288] sm:$0xff]  ;;  %v787_v28 = vld [vmem:[#allocation7 + $0x280] sm:$0xff]  ;;  %v745_v34 = vld [vmem:[#allocation7 + $0x1f8] sm:$0xff] }
 0x202   : > { %554 = vperm.xlu1 %1432, %v522_v39   ;;  %v703_v39 = vld [vmem:[#allocation7 + $0xc8] sm:$0xff]  ;;  %v694_v30 = vld [vmem:[#allocation7 + $0x80] sm:$0xff]  ;;  %v859_v35 = vld [vmem:[#allocation7 + $0x370] sm:$0xff] }
 0x203   : > { %829 = vmatpush.msra.mxu3 %v703_v39  ;;  %771 = vmatpush.msra.mxu1 %v756_v41  ;;  %v695_v25 = vld [vmem:[#allocation7 + $0x88] sm:$0xff]  ;;  %v726_v36 = vld [vmem:[#allocation7 + $0x170] sm:$0xff] }
 0x204   : > { %810 = vmatpush.msra.mxu2 %v795_v42  ;;  %v917_v37 = vld [vmem:[#allocation7 + $0x3f0] sm:$0xff]  ;;  %v858_v39 = vld [vmem:[#allocation7 + $0x368] sm:$0xff] }
 0x205   : > { %v744_v38 = vld [vmem:[#allocation7 + $0x1f0] sm:$0xff]  ;;  %v725_v40 = vld [vmem:[#allocation7 + $0x168] sm:$0xff] }
 0x206   : > { %811 = vmatpush.msra.mxu2 %v794_v46  ;;  %v916_v41 = vld [vmem:[#allocation7 + $0x3e8] sm:$0xff]  ;;  %v742_v46 = vld [vmem:[#allocation7 + $0x1e0] sm:$0xff] }
 0x207   : > { %578 = vperm.xlu0 %1431, %v528_v43   ;;  %v702_v43 = vld [vmem:[#allocation7 + $0xc0] sm:$0xff]  ;;  %v743_v42 = vld [vmem:[#allocation7 + $0x1e8] sm:$0xff] }
 0x208   : > { %550 = vperm.xlu2 %1430, %v521_v44   ;;  %v662_v44 = vld [vmem:[#allocation7 + $0x38] sm:$0xff]  ;;  %830 = vmatpush.msra.mxu3 %v702_v43  ;;  %v857_v43 = vld [vmem:[#allocation7 + $0x360] sm:$0xff] }
 0x209   : > { %679 = vmatpush.msra.mxu0 %v662_v44  ;;  %v724_v44 = vld [vmem:[#allocation7 + $0x160] sm:$0xff] }
 0x20a   : > { %562 = vperm.xlu1 %1432, %v524_v45   ;;  %v755_v45 = vld [vmem:[#allocation7 + $0x238] sm:$0xff]  ;;  %831 = vmatpush.msra.mxu3 %v701_v47 }
 0x20b   : > { %772 = vmatpush.msra.mxu1 %v755_v45  ;;  %680 = vmatpush.msra.mxu0 %v661_v48  ;;  %v915_v45 = vld [vmem:[#allocation7 + $0x3e0] sm:$0xff] }
 0x20c   : > { %832 = vmatpush.msra.mxu3 %v700_v52  ;;  %v914_v52 = vld [vmem:[#allocation7 + $0x3d8] sm:$0xff] }
 0x20d   : > { %681 = vmatpush.msra.mxu0 %v660_v53  ;;  %v741_v53 = vld [vmem:[#allocation7 + $0x1d8] sm:$0xff] }
 0x20e   : > { %833 = vmatpush.msra.mxu3 %v699_v56 }
 0x20f   : > { %590 = vperm.xlu0 %1431, %v531_v49  }
 0x210   : > { %558 = vperm.xlu2 %1430, %v523_v50   ;;  %v754_v50 = vld [vmem:[#allocation7 + $0x230] sm:$0xff]  ;;  %834 = vmatpush.msra.mxu3 %v698_v61  ;;  %v854_v61 = vld [vmem:[#allocation7 + $0x348] sm:$0xff] }
 0x211   : > { %773 = vmatpush.msra.mxu1 %v754_v50  ;;  %v856_v50 = vld [vmem:[#allocation7 + $0x358] sm:$0xff] }
 0x212   : > { %574 = vperm.xlu1 %1432, %v527_v51   ;;  %v793_v51 = vld [vmem:[#allocation7 + $0x2b0] sm:$0xff]  ;;  %835 = vmatpush.msra.mxu3 %v697_v17  ;;  %v853_v17 = vld [vmem:[#allocation7 + $0x340] sm:$0xff] }
 0x213   : > { %812 = vmatpush.msra.mxu2 %v793_v51  ;;  %v723_v51 = vld [vmem:[#allocation7 + $0x158] sm:$0xff] }
 0x214   : > { %836 = vmatpush.msra.mxu3 %v696_v21 }
 0x216   : > { %837 = vmatpush.msra.mxu3 %v695_v25  ;;  %v719_v25 = vld [vmem:[#allocation7 + $0x138] sm:$0xff] }
 0x218   : > { %570 = vperm.xlu2 %1430, %v526_v54   ;;  %v753_v54 = vld [vmem:[#allocation7 + $0x228] sm:$0xff]  ;;  %838 = vmatpush.msra.mxu3 %v694_v30 }
 0x219   : > { %774 = vmatpush.msra.mxu1 %v753_v54  ;;  %v855_v54 = vld [vmem:[#allocation7 + $0x350] sm:$0xff] }
 0x21a   : > { %586 = vperm.xlu1 %1432, %v530_v55   ;;  %v792_v55 = vld [vmem:[#allocation7 + $0x2a8] sm:$0xff]  ;;  %939 = vmatpush.msrb.mxu3 %v745_v34 }
 0x21b   : > { %813 = vmatpush.msra.mxu2 %v792_v55  ;;  %775 = vmatpush.msra.mxu1 %v752_v58  ;;  %v722_v55 = vld [vmem:[#allocation7 + $0x150] sm:$0xff] }
 0x21c   : > { %940 = vmatpush.msrb.mxu3 %v744_v38  ;;  %v740_v58 = vld [vmem:[#allocation7 + $0x1d0] sm:$0xff]  ;;  %v735_v38 = vld [vmem:[#allocation7 + $0x1a8] sm:$0xff] }
 0x21d   : > { %776 = vmatpush.msra.mxu1 %v751_v63  ;;  %v912_v63 = vld [vmem:[#allocation7 + $0x3c8] sm:$0xff] }
 0x21e   : > { %941 = vmatpush.msrb.mxu3 %v743_v42 }
 0x21f   : > { %777 = vmatpush.msra.mxu1 %v750_v19  ;;  %v911_v19 = vld [vmem:[#allocation7 + $0x3c0] sm:$0xff] }
 0x220   : > { %582 = vperm.xlu2 %1430, %v529_v57   ;;  %v659_v57 = vld [vmem:[#allocation7 + $0x20] sm:$0xff]  ;;  %942 = vmatpush.msrb.mxu3 %v742_v46 }
 0x221   : > { %682 = vmatpush.msra.mxu0 %v659_v57  ;;  %778 = vmatpush.msra.mxu1 %v749_v23  ;;  %v913_v57 = vld [vmem:[#allocation7 + $0x3d0] sm:$0xff] }
 0x222   : > { %943 = vmatpush.msrb.mxu3 %v741_v53 }
 0x223   : > { %683 = vmatpush.msra.mxu0 %v658_v62  ;;  %779 = vmatpush.msra.mxu1 %v748_v27  ;;  %v721_v62 = vld [vmem:[#allocation7 + $0x148] sm:$0xff]  ;;  %v737_v27 = vld [vmem:[#allocation7 + $0x1b8] sm:$0xff] }
 0x224   : > { %944 = vmatpush.msrb.mxu3 %v740_v58 }
 0x225   : > { %684 = vmatpush.msra.mxu0 %v657_v18  ;;  %881 = vmatpush.msrb.mxu1 %v727_v32  ;;  %v720_v18 = vld [vmem:[#allocation7 + $0x140] sm:$0xff]  ;;  %v909_v32 = vld [vmem:[#allocation7 + $0x3b0] sm:$0xff] }
 0x227   : > { %685 = vmatpush.msra.mxu0 %v656_v22  ;;  %882 = vmatpush.msrb.mxu1 %v726_v36  ;;  %v717_v36 = vld [vmem:[#allocation7 + $0x128] sm:$0xff] }
 0x228   : > { %594 = vperm.xlu2 %1430, %v532_v59   ;;  %v791_v59 = vld [vmem:[#allocation7 + $0x2a0] sm:$0xff] }
 0x229   : > { %814 = vmatpush.msra.mxu2 %v791_v59  ;;  %686 = vmatpush.msra.mxu0 %v655_v26  ;;  %v1581_v59 = vmov 0.0   ;;  %v910_v26 = vld [vmem:[#allocation7 + $0x3b8] sm:$0xff] }
 0x22a   : > { %883 = vmatpush.msrb.mxu1 %v725_v40  ;;  %613 = vst [vmem:[#allocation2] sm:$0xff] %v1581_v59  ;;  %v716_v40 = vld [vmem:[#allocation7 + $0x120] sm:$0xff] }
 0x22b   : > { %815 = vmatpush.msra.mxu2 %v790_v16  ;;  %861 = vmatpush.msrb.mxu0 %v860_v31  ;;  %614 = vst [vmem:[#allocation2 + $0x8] sm:$0x3f] %v1581_v59  ;;  %v739_v16 = vld [vmem:[#allocation7 + $0x1c8] sm:$0xff]  ;;  %v718_v31 = vld [vmem:[#allocation7 + $0x130] sm:$0xff] }
 0x22c   : > { %884 = vmatpush.msrb.mxu1 %v724_v44  ;;  %615 = vst [vmem:[#allocation2 + $0x10] sm:$0xff] %v1581_v59  ;;  %945 = vmatpush.msrb.mxu3 %v739_v16  ;;  %v715_v44 = vld [vmem:[#allocation7 + $0x118] sm:$0xff]  ;;  %v712_v16 = vld [vmem:[#allocation7 + $0x100] sm:$0xff] }
 0x22d   : > { %816 = vmatpush.msra.mxu2 %v789_v20  ;;  %862 = vmatpush.msrb.mxu0 %v859_v35  ;;  %616 = vst [vmem:[#allocation2 + $0x18] sm:$0x3f] %v1581_v59  ;;  %v738_v20 = vld [vmem:[#allocation7 + $0x1c0] sm:$0xff]  ;;  %v850_v35 = vld [vmem:[#allocation7 + $0x328] sm:$0xff] }
 0x22e   : > { %885 = vmatpush.msrb.mxu1 %v723_v51  ;;  %946 = vmatpush.msrb.mxu3 %v738_v20  ;;  %v714_v51 = vld [vmem:[#allocation7 + $0x110] sm:$0xff] }
 0x22f   : > { %817 = vmatpush.msra.mxu2 %v788_v24  ;;  %863 = vmatpush.msrb.mxu0 %v858_v39  ;;  %v852_v24 = vld [vmem:[#allocation7 + $0x338] sm:$0xff]  ;;  %v849_v39 = vld [vmem:[#allocation7 + $0x320] sm:$0xff] }
 0x230   : > { %886 = vmatpush.msrb.mxu1 %v722_v55  ;;  %947 = vmatpush.msrb.mxu3 %v737_v27  ;;  %v732_v55 = vld [vmem:[#allocation7 + $0x190] sm:$0xff] }
 0x231   : > { %818 = vmatpush.msra.mxu2 %v787_v28  ;;  %864 = vmatpush.msrb.mxu0 %v857_v43  ;;  %v848_v43 = vld [vmem:[#allocation7 + $0x318] sm:$0xff] }
 0x232   : > { %887 = vmatpush.msrb.mxu1 %v721_v62 }
 0x233   : > { %919 = vmatpush.msrb.mxu2 %v918_v33  ;;  %865 = vmatpush.msrb.mxu0 %v856_v50  ;;  %v736_v33 = vld [vmem:[#allocation7 + $0x1b0] sm:$0xff]  ;;  %v906_v50 = vld [vmem:[#allocation7 + $0x398] sm:$0xff] }
 0x234   : > { %888 = vmatpush.msrb.mxu1 %v720_v18  ;;  %948 = vmatpush.msrb.mxu3 %v736_v33 }
 0x235   : > { %920 = vmatpush.msrb.mxu2 %v917_v37  ;;  %866 = vmatpush.msrb.mxu0 %v855_v54  ;;  %v908_v37 = vld [vmem:[#allocation7 + $0x3a8] sm:$0xff] }
 0x236   : > { %889 = vmatpush.msrb.mxu1 %v719_v25  ;;  %949 = vmatpush.msrb.mxu3 %v735_v38 }
 0x237   : > { %921 = vmatpush.msrb.mxu2 %v916_v41  ;;  %867 = vmatpush.msrb.mxu0 %v854_v61 }
 0x238   : > { %890 = vmatpush.msrb.mxu1 %v718_v31 }
 0x239   : > { %922 = vmatpush.msrb.mxu2 %v915_v45  ;;  %868 = vmatpush.msrb.mxu0 %v853_v17 }
 0x23a   : > { %891 = vmatpush.msrb.mxu1 %v717_v36 }
 0x23b   : > { %923 = vmatpush.msrb.mxu2 %v914_v52  ;;  %869 = vmatpush.msrb.mxu0 %v852_v24 }
 0x23c   : > { %892 = vmatpush.msrb.mxu1 %v716_v40 }
 0x23d   : > { %924 = vmatpush.msrb.mxu2 %v913_v57  ;;  %v713_v57 = vld [vmem:[#allocation7 + $0x108] sm:$0xff] }
 0x23e   : > { %893 = vmatpush.msrb.mxu1 %v715_v44 }
 0x23f   : > { %925 = vmatpush.msrb.mxu2 %v912_v63  ;;  %v845_v63 = vld [vmem:[#allocation7 + $0x300] sm:$0xff] }
 0x240   : > { %894 = vmatpush.msrb.mxu1 %v714_v51 }
 0x241   : > { %926 = vmatpush.msrb.mxu2 %v911_v19  ;;  %v730_v19 = vld [vmem:[#allocation7 + $0x180] sm:$0xff] }
 0x242   : > { %895 = vmatpush.msrb.mxu1 %v713_v57  ;;  %v1014_v57 = vld [vmem:[#allocation7 + $0x4f0] sm:$0xff] }
 0x243   : > { %927 = vmatpush.msrb.mxu2 %v910_v26 }
 0x244   : > { %896 = vmatpush.msrb.mxu1 %v712_v16  ;;  %v973_v16 = vld [vmem:[#allocation7 + $0x460] sm:$0xff] }
 0x245   : > { %928 = vmatpush.msrb.mxu2 %v909_v32 }
 0x247   : > { %929 = vmatpush.msrb.mxu2 %v908_v37 }
 0x252   : > { %v1847_v49 = vpop.permute.xlu2 %534 }
 0x253   : > { %v1859_v22 = vmul.f32 %v1847_v49, %v1746_v1 }
 0x25a   : > { %v1849_v60 = vpop.permute.xlu2 %546 }
 0x25b   : > { %v1873_v34 = vmul.f32 %v1849_v60, %v1770_v7  ;;  %v907_v7 = vld [vmem:[#allocation7 + $0x3a0] sm:$0xff] }
 0x25c   : > { %v734_v60 = vld [vmem:[#allocation7 + $0x1a0] sm:$0xff]  ;;  %930 = vmatpush.msrb.mxu2 %v907_v7 }
 0x25d   : > { %950 = vmatpush.msrb.mxu3 %v734_v60 }
 0x25e   : > { %931 = vmatpush.msrb.mxu2 %v906_v50  ;;  %v976_v50 = vld [vmem:[#allocation7 + $0x478] sm:$0xff] }
 0x262   : > { %v1851_v29 = vpop.permute.xlu2 %550 }
 0x263   : > { %v1878_v41 = vmul.f32 %v1851_v29, %v1773_v8  ;;  %v733_v8 = vld [vmem:[#allocation7 + $0x198] sm:$0xff]  ;;  %v847_v29 = vld [vmem:[#allocation7 + $0x310] sm:$0xff] }
 0x264   : > { %951 = vmatpush.msrb.mxu3 %v733_v8  ;;  %v1015_v8 = vld [vmem:[#allocation7 + $0x4f8] sm:$0xff] }
 0x265   : > { %v617_v31 = vmax.f32 %v1859_v22, %v1878_v41 }
 0x266   : > { %952 = vmatpush.msrb.mxu3 %v732_v55  ;;  %v1093_v55 = vld [vmem:[#allocation7 + $0x5f8] sm:$0xff] }
 0x269   : > { %v1853_v47 = vpop.permute.xlu0 %566 }
 0x26a   : > { %v1855_v48 = vpop.permute.xlu2 %558  ;;  %v1896_v17 = vmul.f32 %v1853_v47, %v1743_v0 }
 0x26b   : > { %v1887_v52 = vmul.f32 %v1855_v48, %v1794_v13  ;;  %v904_v13 = vld [vmem:[#allocation7 + $0x388] sm:$0xff] }
 0x26c   : > { %v543_v56 = vpop.permute.xlu1 %542  ;;  %v731_v48 = vld [vmem:[#allocation7 + $0x188] sm:$0xff] }
 0x26d   : > { %v1865_v28 = vmul.f32 %v543_v56, %v1749_v2  ;;  %v846_v56 = vld [vmem:[#allocation7 + $0x308] sm:$0xff]  ;;  %953 = vmatpush.msrb.mxu3 %v731_v48 }
 0x26e   : > { %v1052_v48 = vld [vmem:[#allocation7 + $0x568] sm:$0xff] }
 0x26f   : > { %954 = vmatpush.msrb.mxu3 %v730_v19  ;;  %v619_v25 = vmax.f32 %v1865_v28, %v1887_v52  ;;  %v1090_v19 = vld [vmem:[#allocation7 + $0x5e0] sm:$0xff] }
 0x271   : > { %v539_v21 = vpop.permute.xlu0 %538 }
 0x272   : > { %v1862_v23 = vmul.f32 %v539_v21, %v1758_v4  ;;  %v1867_v30 = vpop.permute.xlu2 %570  ;;  %v851_v4 = vld [vmem:[#allocation7 + $0x330] sm:$0xff] }
 0x273   : > { %870 = vmatpush.msrb.mxu0 %v851_v4  ;;  %v1901_v20 = vmul.f32 %v1867_v30, %v1755_v3 }
 0x274   : > { %v633_v1 = vadd.f32 %v1862_v23, %v1859_v22  ;;  %v555_v49 = vpop.permute.xlu1 %554 }
 0x275   : > { %871 = vmatpush.msrb.mxu0 %v850_v35  ;;  %v1882_v45 = vmul.f32 %v555_v49, %v1779_v9  ;;  %v905_v9 = vld [vmem:[#allocation7 + $0x390] sm:$0xff] }
 0x276   : > { %v634_v2 = vadd.f32 %v633_v1, %v1865_v28  ;;  %932 = vmatpush.msrb.mxu2 %v905_v9  ;;  %v1054_v9 = vld [vmem:[#allocation7 + $0x578] sm:$0xff] }
 0x277   : > { %872 = vmatpush.msrb.mxu0 %v849_v39  ;;  %v618_v27 = vmax.f32 %v1862_v23, %v1882_v45 }
 0x278   : > { %v635_v42 = vadd.f32 %v634_v2, %v1873_v34  ;;  %933 = vmatpush.msrb.mxu2 %v904_v13  ;;  %v621_v2 = vmax.f32 %v617_v31, %v1896_v17  ;;  %v1013_v13 = vld [vmem:[#allocation7 + $0x4e8] sm:$0xff] }
 0x279   : > { %873 = vmatpush.msrb.mxu0 %v848_v43  ;;  %v579_v59 = vpop.permute.xlu0 %578  ;;  %v622_v36 = vmax.f32 %v618_v27, %v1901_v20  ;;  %v1050_v27 = vld [vmem:[#allocation7 + $0x558] sm:$0xff]  ;;  %v970_v31 = vld [vmem:[#allocation7 + $0x448] sm:$0xff] }
 0x27a   : > { %v636_v46 = vadd.f32 %v635_v42, %v1878_v41  ;;  %v583_v58 = vpop.permute.xlu2 %582  ;;  %v1911_v26 = vmul.f32 %v579_v59, %v1767_v6  ;;  %v1092_v59 = vld [vmem:[#allocation7 + $0x5f0] sm:$0xff] }
 0x27b   : > { %874 = vmatpush.msrb.mxu0 %v847_v29  ;;  %v1923_v6 = vmul.f32 %v583_v58, %v1782_v10  ;;  %v1053_v58 = vld [vmem:[#allocation7 + $0x570] sm:$0xff] }
 0x27c   : > { %v637_v53 = vadd.f32 %v636_v46, %v1882_v45  ;;  %v563_v54 = vpop.permute.xlu1 %562 }
 0x27d   : > { %v1891_v61 = vmul.f32 %v563_v54, %v1797_v14  ;;  %875 = vmatpush.msrb.mxu0 %v846_v56  ;;  %v903_v14 = vld [vmem:[#allocation7 + $0x380] sm:$0xff]  ;;  %v975_v56 = vld [vmem:[#allocation7 + $0x470] sm:$0xff] }
 0x27e   : > { %v638_v62 = vadd.f32 %v637_v53, %v1887_v52  ;;  %934 = vmatpush.msrb.mxu2 %v903_v14  ;;  %v1051_v14 = vld [vmem:[#allocation7 + $0x560] sm:$0xff] }
 0x27f   : > { %876 = vmatpush.msrb.mxu0 %v845_v63  ;;  %v620_v49 = vmax.f32 %v1873_v34, %v1891_v61  ;;  %v1091_v63 = vld [vmem:[#allocation7 + $0x5e8] sm:$0xff] }
 0x280   : > { %v639_v18 = vadd.f32 %v638_v62, %v1891_v61  ;;  %v974_v62 = vld [vmem:[#allocation7 + $0x468] sm:$0xff] }
 0x281   : > { %v591_v1 = vpop.permute.xlu0 %590  ;;  %v624_v37 = vmax.f32 %v620_v49, %v1911_v26  ;;  %v1010_v49 = vld [vmem:[#allocation7 + $0x4d0] sm:$0xff] }
 0x282   : > { %v640_v21 = vadd.f32 %v639_v18, %v1896_v17  ;;  %v595_v30 = vpop.permute.xlu2 %594  ;;  %v1929_v33 = vmul.f32 %v591_v1, %v1791_v12  ;;  %v1012_v18 = vld [vmem:[#allocation7 + $0x4e0] sm:$0xff]  ;;  %v971_v1 = vld [vmem:[#allocation7 + $0x450] sm:$0xff] }
 0x283   : > { %v1926_v32 = vmul.f32 %v595_v30, %v1803_v15  ;;  %v625_v15 = vmax.f32 %v621_v2, %v1923_v6  ;;  %v1089_v30 = vld [vmem:[#allocation7 + $0x5d8] sm:$0xff]  ;;  %v1009_v2 = vld [vmem:[#allocation7 + $0x4c8] sm:$0xff] }
 0x284   : > { %v575_v0 = vpop.permute.xlu1 %574  ;;  %v641_v47 = vadd.f32 %v640_v21, %v1901_v20  ;;  %v972_v21 = vld [vmem:[#allocation7 + $0x458] sm:$0xff] }
 0x285   : > { %v1906_v24 = vmul.f32 %v575_v0, %v1761_v5  ;;  %v628_v40 = vmax.f32 %v624_v37, %v1926_v32  ;;  %v969_v37 = vld [vmem:[#allocation7 + $0x440] sm:$0xff] }
 0x287   : > { %v642_v3 = vadd.f32 %v641_v47, %v1906_v24  ;;  %v623_v4 = vmax.f32 %v619_v25, %v1906_v24  ;;  %v1011_v25 = vld [vmem:[#allocation7 + $0x4d8] sm:$0xff] }
 0x289   : > { %v643_v5 = vadd.f32 %v642_v3, %v1911_v26  ;;  %v627_v38 = vmax.f32 %v623_v4, %v1929_v33  ;;  %v1049_v4 = vld [vmem:[#allocation7 + $0x550] sm:$0xff] }
 0x28b   : > { %v644_v10 = vadd.f32 %v643_v5, %v1923_v6  ;;  %v630_v7 = vmax.f32 %v627_v38, %v628_v40  ;;  %v1088_v5 = vld [vmem:[#allocation7 + $0x5d0] sm:$0xff]  ;;  %v1008_v38 = vld [vmem:[#allocation7 + $0x4c0] sm:$0xff]  ;;  %v968_v40 = vld [vmem:[#allocation7 + $0x438] sm:$0xff] }
 0x28c   : > { %v587_v35 = vpop.permute.xlu1 %586 }
 0x28d   : > { %v1936_v39 = vmul.f32 %v587_v35, %v1785_v11  ;;  %v1048_v35 = vld [vmem:[#allocation7 + $0x548] sm:$0xff] }
 0x28f   : > { %v626_v12 = vmax.f32 %v622_v36, %v1936_v39  ;;  %v645_v42 = vadd.f32 %v644_v10, %v1936_v39  ;;  %v1087_v36 = vld [vmem:[#allocation7 + $0x5c8] sm:$0xff]  ;;  %v1047_v10 = vld [vmem:[#allocation7 + $0x540] sm:$0xff] }
 0x291   : > { %v629_v60 = vmax.f32 %v625_v15, %v626_v12  ;;  %v646_v43 = vadd.f32 %v645_v42, %v1929_v33  ;;  %v1086_v15 = vld [vmem:[#allocation7 + $0x5c0] sm:$0xff]  ;;  %v1007_v12 = vld [vmem:[#allocation7 + $0x4b8] sm:$0xff] }
 0x292   : > { %v1046_v42 = vld [vmem:[#allocation7 + $0x538] sm:$0xff] }
 0x293   : > { %v631_v44 = vmax.f32 %v629_v60, %v630_v7  ;;  %v647_v46 = vadd.f32 %v646_v43, %v1926_v32  ;;  %v1085_v7 = vld [vmem:[#allocation7 + $0x5b8] sm:$0xff]  ;;  %v967_v60 = vld [vmem:[#allocation7 + $0x430] sm:$0xff] }
 0x294   : > { %v1006_v43 = vld [vmem:[#allocation7 + $0x4b0] sm:$0xff] }
 0x295   : > { %632 = vst [vmem:[#allocation2 + $0x3] sm:$0xff] %v631_v44  ;;  %v1945_v11 = vmul.f32 0.0625, %v647_v46  ;;  %v1084_v46 = vld [vmem:[#allocation7 + $0x5b0] sm:$0xff] }
 0x297   : > { %650 = vst [vmem:[#allocation2 + $0x13] sm:$0xff] %v1945_v11 }
 0x29c   : > { %v654_v29 = vld [vmem:[#allocation2] sm:$0xff] }
 0x29d   : > { %v746_v51 = vld [vmem:[#allocation2 + $0x4] sm:$0xff]  ;;  %687 = vmatmul.f32.vlgmr.msra.gmra.mxu0 %v654_v29 }
 0x29e   : > { %v785_v53 = vld [vmem:[#allocation2 + $0x5] sm:$0xff]  ;;  %780 = vmatmul.f32.vlgmr.msra.gmra.mxu1 %v746_v51  ;;  %977 = vmatpush.msra.mxu0 %v976_v50  ;;  %v901_v3 = vld [vmem:[#allocation2 + $0x10] sm:$0xff] }
 0x29f   : > { %v692_v54 = vld [vmem:[#allocation2 + $0x1] sm:$0xff]  ;;  %819 = vmatmul.f32.vlgmr.msra.gmra.mxu2 %v785_v53  ;;  %1016 = vmatpush.msra.mxu1 %v1015_v8 }
 0x2a0   : > { %839 = vmatmul.f32.vlgmr.msra.gmra.mxu3 %v692_v54  ;;  %1055 = vmatpush.msra.mxu2 %v1054_v9  ;;  %v843_v0 = vld [vmem:[#allocation2 + $0x6] sm:$0xff] }
 0x2a1   : > { %1094 = vmatpush.msra.mxu3 %v1093_v55  ;;  %978 = vmatpush.msra.mxu0 %v975_v56  ;;  %v710_v47 = vld [vmem:[#allocation2 + $0x2] sm:$0xff]  ;;  %v964_v56 = vld [vmem:[#allocation7 + $0x418] sm:$0xff] }
 0x2a2   : > { %1017 = vmatpush.msra.mxu1 %v1014_v57  ;;  %1056 = vmatpush.msra.mxu2 %v1053_v58  ;;  %v966_v50 = vld [vmem:[#allocation7 + $0x428] sm:$0xff]  ;;  %v965_v53 = vld [vmem:[#allocation7 + $0x420] sm:$0xff]  ;;  %v1003_v57 = vld [vmem:[#allocation7 + $0x498] sm:$0xff] }
 0x2a3   : > { %1095 = vmatpush.msra.mxu3 %v1092_v59  ;;  %979 = vmatpush.msra.mxu0 %v974_v62  ;;  %v1005_v8 = vld [vmem:[#allocation7 + $0x4a8] sm:$0xff]  ;;  %v1004_v54 = vld [vmem:[#allocation7 + $0x4a0] sm:$0xff]  ;;  %v1042_v58 = vld [vmem:[#allocation7 + $0x518] sm:$0xff] }
 0x2a4   : > { %1018 = vmatpush.msra.mxu1 %v1013_v13  ;;  %1057 = vmatpush.msra.mxu2 %v1052_v48  ;;  %v1044_v29 = vld [vmem:[#allocation7 + $0x528] sm:$0xff]  ;;  %v1043_v9 = vld [vmem:[#allocation7 + $0x520] sm:$0xff]  ;;  %v1081_v59 = vld [vmem:[#allocation7 + $0x598] sm:$0xff] }
 0x2a5   : > { %1096 = vmatpush.msra.mxu3 %v1091_v63  ;;  %980 = vmatpush.msra.mxu0 %v973_v16  ;;  %v1083_v51 = vld [vmem:[#allocation7 + $0x5a8] sm:$0xff]  ;;  %v1082_v55 = vld [vmem:[#allocation7 + $0x5a0] sm:$0xff]  ;;  %v963_v62 = vld [vmem:[#allocation7 + $0x410] sm:$0xff] }
 0x2a6   : > { %1019 = vmatpush.msra.mxu1 %v1012_v18  ;;  %1058 = vmatpush.msra.mxu2 %v1051_v14  ;;  %v1002_v13 = vld [vmem:[#allocation7 + $0x490] sm:$0xff]  ;;  %v962_v16 = vld [vmem:[#allocation7 + $0x408] sm:$0xff] }
 0x2a7   : > { %1097 = vmatpush.msra.mxu3 %v1090_v19  ;;  %877 = vmatmul.f32.vlgmr.msrb.gmra.mxu0 %v843_v0  ;;  %v1041_v48 = vld [vmem:[#allocation7 + $0x510] sm:$0xff]  ;;  %v1001_v18 = vld [vmem:[#allocation7 + $0x488] sm:$0xff]  ;;  %v1000_v0 = vld [vmem:[#allocation7 + $0x480] sm:$0xff] }
 0x2a8   : > { %897 = vmatmul.f32.vlgmr.msrb.gmra.mxu1 %v710_v47  ;;  %935 = vmatmul.f32.vlgmr.msrb.gmra.mxu2 %v901_v3  ;;  %v1080_v63 = vld [vmem:[#allocation7 + $0x590] sm:$0xff]  ;;  %v1040_v14 = vld [vmem:[#allocation7 + $0x508] sm:$0xff]  ;;  %v1039_v47 = vld [vmem:[#allocation7 + $0x500] sm:$0xff] }
 0x2a9   : > { %955 = vmatmul.f32.vlgmr.msrb.gmra.mxu3 %v631_v44  ;;  %981 = vmatpush.msra.mxu0 %v972_v21  ;;  %v1045_v44 = vld [vmem:[#allocation7 + $0x530] sm:$0xff]  ;;  %v1079_v19 = vld [vmem:[#allocation7 + $0x588] sm:$0xff]  ;;  %v961_v21 = vld [vmem:[#allocation7 + $0x400] sm:$0xff] }
 0x2aa   : > { %1020 = vmatpush.msra.mxu1 %v1011_v25  ;;  %1059 = vmatpush.msra.mxu2 %v1050_v27  ;;  %v1078_v25 = vld [vmem:[#allocation7 + $0x580] sm:$0xff]  ;;  %v959_v3 = vld [vmem:[#allocation2 + $0x11] sm:$0xff] }
 0x2ab   : > { %1098 = vmatpush.msra.mxu3 %v1089_v30  ;;  %982 = vmatpush.msra.mxu0 %v971_v1  ;;  %v998_v27 = vld [vmem:[#allocation2 + $0x12] sm:$0xff] }
 0x2ac   : > { %1021 = vmatpush.msra.mxu1 %v1010_v49  ;;  %1060 = vmatpush.msra.mxu2 %v1049_v4  ;;  %v1132_v30 = vld [vmem:[#allocation7 + $0x678] sm:$0xff]  ;;  %v1131_v4 = vld [vmem:[#allocation7 + $0x670] sm:$0xff] }
 0x2ad   : > { %1099 = vmatpush.msra.mxu3 %v1088_v5  ;;  %983 = vmatpush.msra.mxu0 %v970_v31  ;;  %v1171_v1 = vld [vmem:[#allocation7 + $0x6f8] sm:$0xff]  ;;  %v1170_v5 = vld [vmem:[#allocation7 + $0x6f0] sm:$0xff]  ;;  %v1130_v31 = vld [vmem:[#allocation7 + $0x668] sm:$0xff] }
 0x2ae   : > { %1022 = vmatpush.msra.mxu1 %v1009_v2  ;;  %1061 = vmatpush.msra.mxu2 %v1048_v35  ;;  %v1076_v49 = vld [vmem:[#allocation2 + $0x14] sm:$0xff]  ;;  %v1169_v2 = vld [vmem:[#allocation7 + $0x6e8] sm:$0xff]  ;;  %v1129_v35 = vld [vmem:[#allocation7 + $0x660] sm:$0xff] }
 0x2af   : > { %1100 = vmatpush.msra.mxu3 %v1087_v36  ;;  %984 = vmatpush.msra.mxu0 %v969_v37  ;;  %v1168_v36 = vld [vmem:[#allocation7 + $0x6e0] sm:$0xff]  ;;  %v1128_v37 = vld [vmem:[#allocation7 + $0x658] sm:$0xff] }
 0x2b0   : > { %1023 = vmatpush.msra.mxu1 %v1008_v38  ;;  %1062 = vmatpush.msra.mxu2 %v1047_v10  ;;  %v1167_v38 = vld [vmem:[#allocation7 + $0x6d8] sm:$0xff]  ;;  %v1127_v10 = vld [vmem:[#allocation7 + $0x650] sm:$0xff] }
 0x2b1   : > { %1101 = vmatpush.msra.mxu3 %v1086_v15  ;;  %985 = vmatpush.msra.mxu0 %v968_v40  ;;  %v1166_v15 = vld [vmem:[#allocation7 + $0x6d0] sm:$0xff]  ;;  %v1165_v40 = vld [vmem:[#allocation7 + $0x6c8] sm:$0xff] }
 0x2b2   : > { %1024 = vmatpush.msra.mxu1 %v1007_v12  ;;  %1063 = vmatpush.msra.mxu2 %v1046_v42  ;;  %v1125_v12 = vld [vmem:[#allocation7 + $0x640] sm:$0xff] }
 0x2b3   : > { %1102 = vmatpush.msra.mxu3 %v1085_v7  ;;  %986 = vmatpush.msra.mxu0 %v967_v60  ;;  %v1164_v42 = vld [vmem:[#allocation7 + $0x6c0] sm:$0xff]  ;;  %v1124_v7 = vld [vmem:[#allocation7 + $0x638] sm:$0xff] }
 0x2b4   : > { %1025 = vmatpush.msra.mxu1 %v1006_v43  ;;  %1064 = vmatpush.msra.mxu2 %v1045_v44  ;;  %v1163_v60 = vld [vmem:[#allocation7 + $0x6b8] sm:$0xff]  ;;  %v1123_v43 = vld [vmem:[#allocation7 + $0x630] sm:$0xff] }
 0x2b5   : > { %1103 = vmatpush.msra.mxu3 %v1084_v46  ;;  %987 = vmatpush.msra.mxu0 %v966_v50  ;;  %v1162_v44 = vld [vmem:[#allocation7 + $0x6b0] sm:$0xff]  ;;  %v1122_v46 = vld [vmem:[#allocation7 + $0x628] sm:$0xff] }
 0x2b6   : > { %1026 = vmatpush.msra.mxu1 %v1005_v8  ;;  %1065 = vmatpush.msra.mxu2 %v1044_v29  ;;  %v1161_v50 = vld [vmem:[#allocation7 + $0x6a8] sm:$0xff]  ;;  %v1121_v8 = vld [vmem:[#allocation7 + $0x620] sm:$0xff] }
 0x2b7   : > { %1104 = vmatpush.msra.mxu3 %v1083_v51  ;;  %988 = vmatpush.msra.mxu0 %v965_v53  ;;  %v1160_v29 = vld [vmem:[#allocation7 + $0x6a0] sm:$0xff]  ;;  %v1120_v51 = vld [vmem:[#allocation7 + $0x618] sm:$0xff] }
 0x2b8   : > { %1027 = vmatpush.msra.mxu1 %v1004_v54  ;;  %1066 = vmatpush.msra.mxu2 %v1043_v9  ;;  %v1159_v53 = vld [vmem:[#allocation7 + $0x698] sm:$0xff]  ;;  %v1119_v54 = vld [vmem:[#allocation7 + $0x610] sm:$0xff] }
 0x2b9   : > { %1105 = vmatpush.msra.mxu3 %v1082_v55  ;;  %989 = vmatpush.msra.mxu0 %v964_v56  ;;  %v1158_v9 = vld [vmem:[#allocation7 + $0x690] sm:$0xff]  ;;  %v1118_v55 = vld [vmem:[#allocation7 + $0x608] sm:$0xff] }
 0x2ba   : > { %1028 = vmatpush.msra.mxu1 %v1003_v57  ;;  %1067 = vmatpush.msra.mxu2 %v1042_v58  ;;  %v1157_v56 = vld [vmem:[#allocation7 + $0x688] sm:$0xff]  ;;  %v1117_v57 = vld [vmem:[#allocation7 + $0x600] sm:$0xff] }
 0x2bb   : > { %1106 = vmatpush.msra.mxu3 %v1081_v59  ;;  %990 = vmatpush.msra.mxu0 %v963_v62  ;;  %v1156_v58 = vld [vmem:[#allocation7 + $0x680] sm:$0xff]  ;;  %v1115_v59 = vld [vmem:[#allocation2 + $0x15] sm:$0xff] }
 0x2bc   : > { %1029 = vmatpush.msra.mxu1 %v1002_v13  ;;  %1068 = vmatpush.msra.mxu2 %v1041_v48  ;;  %v1154_v62 = vld [vmem:[#allocation2 + $0x16] sm:$0xff] }
 0x2bd   : > { %1107 = vmatpush.msra.mxu3 %v1080_v63  ;;  %991 = vmatpush.msra.mxu0 %v962_v16 }
 0x2be   : > { %1030 = vmatpush.msra.mxu1 %v1001_v18  ;;  %1069 = vmatpush.msra.mxu2 %v1040_v14 }
 0x2bf   : > { %1108 = vmatpush.msra.mxu3 %v1079_v19  ;;  %992 = vmatpush.msra.mxu0 %v961_v21 }
 0x2c0   : > { %1031 = vmatpush.msra.mxu1 %v1000_v0  ;;  %1070 = vmatpush.msra.mxu2 %v1039_v47  ;;  %v652_v0 = vstv %s651_s13 }
 0x2c1   : > { %1109 = vmatpush.msra.mxu3 %v1078_v25  ;;  %993 = vmatmul.f32.vlgmr.msra.gmra.mxu0 %v959_v3 }
 0x2c2   : > { %1032 = vmatmul.f32.vlgmr.msra.gmra.mxu1 %v998_v27  ;;  %1071 = vmatmul.f32.vlgmr.msra.gmra.mxu2 %v1945_v11  ;;  %v1126_v11 = vld [vmem:[#allocation7 + $0x648] sm:$0xff] }
 0x2c3   : > { %1110 = vmatmul.f32.vlgmr.msra.gmra.mxu3 %v1076_v49  ;;  %1133 = vmatpush.msrb.mxu0 %v1132_v30 }
 0x2c4   : > { %1172 = vmatpush.msrb.mxu1 %v1171_v1 }
 0x2c5   : > { %1134 = vmatpush.msrb.mxu0 %v1131_v4 }
 0x2c6   : > { %1173 = vmatpush.msrb.mxu1 %v1170_v5 }
 0x2c7   : > { %1135 = vmatpush.msrb.mxu0 %v1130_v31 }
 0x2c8   : > { %1174 = vmatpush.msrb.mxu1 %v1169_v2 }
 0x2c9   : > { %1136 = vmatpush.msrb.mxu0 %v1129_v35 }
 0x2ca   : > { %1175 = vmatpush.msrb.mxu1 %v1168_v36 }
 0x2cb   : > { %1137 = vmatpush.msrb.mxu0 %v1128_v37 }
 0x2cc   : > { %1176 = vmatpush.msrb.mxu1 %v1167_v38 }
 0x2cd   : > { %1138 = vmatpush.msrb.mxu0 %v1127_v10 }
 0x2ce   : > { %1177 = vmatpush.msrb.mxu1 %v1166_v15 }
 0x2cf   : > { %1139 = vmatpush.msrb.mxu0 %v1126_v11 }
 0x2d0   : > { %1178 = vmatpush.msrb.mxu1 %v1165_v40 }
 0x2d1   : > { %1140 = vmatpush.msrb.mxu0 %v1125_v12 }
 0x2d2   : > { %1179 = vmatpush.msrb.mxu1 %v1164_v42 }
 0x2d3   : > { %1141 = vmatpush.msrb.mxu0 %v1124_v7 }
 0x2d4   : > { %1180 = vmatpush.msrb.mxu1 %v1163_v60 }
 0x2d5   : > { %1142 = vmatpush.msrb.mxu0 %v1123_v43 }
 0x2d6   : > { %1181 = vmatpush.msrb.mxu1 %v1162_v44 }
 0x2d7   : > { %1143 = vmatpush.msrb.mxu0 %v1122_v46 }
 0x2d8   : > { %1182 = vmatpush.msrb.mxu1 %v1161_v50 }
 0x2d9   : > { %1144 = vmatpush.msrb.mxu0 %v1121_v8 }
 0x2da   : > { %1183 = vmatpush.msrb.mxu1 %v1160_v29 }
 0x2db   : > { %1145 = vmatpush.msrb.mxu0 %v1120_v51 }
 0x2dc   : > { %1184 = vmatpush.msrb.mxu1 %v1159_v53 }
 0x2dd   : > { %1146 = vmatpush.msrb.mxu0 %v1119_v54 }
 0x2de   : > { %1185 = vmatpush.msrb.mxu1 %v1158_v9 }
 0x2df   : > { %1147 = vmatpush.msrb.mxu0 %v1118_v55 }
 0x2e0   : > { %1186 = vmatpush.msrb.mxu1 %v1157_v56 }
 0x2e1   : > { %1148 = vmatpush.msrb.mxu0 %v1117_v57 }
 0x2e2   : > { %1187 = vmatpush.msrb.mxu1 %v1156_v58  ;;  %1149 = vmatmul.f32.vlgmr.msrb.gmra.mxu0 %v1115_v59 }
 0x2e3   : > { %1188 = vmatmul.f32.vlgmr.msrb.gmra.mxu1 %v1154_v62 }
 0x31a   : > { %v688_v13 = vpop.f32.mrf.mxu0 }
 0x31b   : > { %v781_v48 = vpop.f32.mrf.mxu1  ;;  %v691_v3 = vadd.f32 %v688_v13, %v652_v0 }
 0x31d   : > { %v784_v1 = vadd.f32 %v781_v48, %v691_v3 }
 0x322   : > { %v820_v63 = vpop.f32.mrf.mxu2 }
 0x323   : > { %v840_v16 = vpop.f32.mrf.mxu3 }
 0x324   : > { %v878_v18 = vpop.f32.mrf.mxu0  ;;  %v841_v49 = vadd.f32 %v840_v16, %v820_v63 }
 0x325   : > { %v898_v14 = vpop.f32.mrf.mxu1 }
 0x326   : > { %v899_v4 = vadd.f32 %v898_v14, %v878_v18 }
 0x32b   : > { %v936_v19 = vpop.f32.mrf.mxu2 }
 0x32c   : > { %v956_v21 = vpop.f32.mrf.mxu3 }
 0x32d   : > { %v957_v5 = vadd.f32 %v956_v21, %v936_v19 }
 0x33e   : > { %v994_v47 = vpop.f32.mrf.mxu0 }
 0x33f   : > { %v1033_v25 = vpop.f32.mrf.mxu1  ;;  %v997_v31 = vadd.f32 %v994_v47, %v784_v1 }
 0x340   : > { %v1036_v2 = vadd.f32 %v1033_v25, %v841_v49 }
 0x345   : > { %v1072_v27 = vpop.f32.mrf.mxu2 }
 0x346   : > { %v1111_v30 = vpop.f32.mrf.mxu3  ;;  %v1075_v35 = vadd.f32 %v1072_v27, %v899_v4 }
 0x347   : > { %v1114_v36 = vadd.f32 %v1111_v30, %v957_v5 }
 0x349   : > { %v1194_v11 = vadd.f32 %v1114_v36, %v1075_v35 }
 0x35f   : > { %v1150_v37 = vpop.f32.mrf.mxu0 }
 0x360   : > { %v1189_v38 = vpop.f32.mrf.mxu1  ;;  %v1153_v10 = vadd.f32 %v1150_v37, %v997_v31 }
 0x361   : > { %v1192_v15 = vadd.f32 %v1189_v38, %v1036_v2 }
 0x363   : > { %v1193_v40 = vadd.f32 %v1192_v15, %v1153_v10 }
 0x365   : > { %v1195_v12 = vadd.f32 %v1194_v11, %v1193_v40 }
 0x367   : > { %v1359_v42 = vmul.f32 -1.442695, %v1195_v12 }
 0x369   : > { %1441 = vpow2.f32 %v1359_v42 }
 0x36f   : > { %v1442_v7 = vpop.eup %1441 }
 0x370   : > { %v1199_v60 = vadd.f32 1.0, %v1442_v7 }
 0x372   : > { %1443 = vrcp.f32 %v1199_v60  ;;  %v1211_v50 = vand.u32 2147483648, %v1199_v60  ;;  %v1209_v29 = vand.u32 2147483647, %v1199_v60  ;;  %vm1205_vm2 = vweird.f32 %v1199_v60 }
 0x374   : > { %v1212_v53 = vor.u32 1.1754944e-38, %v1211_v50  ;;  %vm1210_vm4 = vcmp.eq.f32.partialorder %v1209_v29, 8.507059e+37 }
 0x378   : > { %v1444_v43 = vpop.eup %1443 }
 0x379   : > { %v1201_v44 = vmul.f32 %v1444_v43, %v1199_v60  ;;  %vm1206_vm1 = vweird.f32 %v1444_v43 }
 0x37a   : > { %vm1207_vm3 = vmor %vm1205_vm2, %vm1206_vm1 }
 0x37b   : > { %v1202_v46 = vsub.f32 1.0, %v1201_v44 }
 0x37d   : > { %v1203_v8 = vmul.f32 %v1444_v43, %v1202_v46 }
 0x37f   : > { %v1204_v51 = vadd.f32 %v1444_v43, %v1203_v8 }
 0x381   : > { %v1208_v54 = vsel %vm1207_vm3, %v1444_v43, %v1204_v51 }
 0x382   : > { %v1213_v9 = vsel %vm1210_vm4, %v1212_v53, %v1208_v54 }
 0x383   : > { %v1215_v55 = vmul.f32 %v1213_v9, %v1859_v22  ;;  %v1216_v56 = vmul.f32 %v1213_v9, %v1862_v23  ;;  %v1217_v57 = vmul.f32 %v1213_v9, %v1865_v28  ;;  %v1218_v58 = vmul.f32 %v1213_v9, %v1873_v34 }
 0x384   : > { %v1219_v59 = vmul.f32 %v1213_v9, %v1878_v41  ;;  %v1220_v22 = vmul.f32 %v1213_v9, %v1882_v45  ;;  %v1221_v23 = vmul.f32 %v1213_v9, %v1887_v52  ;;  %v1222_v28 = vmul.f32 %v1213_v9, %v1891_v61 }
 0x385   : > { %1231 = vst [vmem:[%s1956_s12] sm:$0xff] %v1215_v55  ;;  %v1223_v34 = vmul.f32 %v1213_v9, %v1896_v17  ;;  %v1224_v41 = vmul.f32 %v1213_v9, %v1901_v20  ;;  %v1225_v45 = vmul.f32 %v1213_v9, %v1906_v24  ;;  %v1226_v52 = vmul.f32 %v1213_v9, %v1911_v26 }
 0x386   : > { %1232 = vst [vmem:[%s1956_s12 + $0x8] sm:$0xff] %v1216_v56  ;;  %v1227_v61 = vmul.f32 %v1213_v9, %v1923_v6  ;;  %v1228_v17 = vmul.f32 %v1213_v9, %v1936_v39  ;;  %v1229_v20 = vmul.f32 %v1213_v9, %v1929_v33  ;;  %v1230_v24 = vmul.f32 %v1213_v9, %v1926_v32 }
 0x387   : > { %1233 = vst [vmem:[%s1956_s12 + $0x10] sm:$0xff] %v1217_v57 }
 0x388   : > { %1234 = vst [vmem:[%s1956_s12 + $0x18] sm:$0xff] %v1218_v58 }
 0x389   : > { %1235 = vst [vmem:[%s1956_s12 + $0x20] sm:$0xff] %v1219_v59 }
 0x38a   : > { %1236 = vst [vmem:[%s1956_s12 + $0x28] sm:$0xff] %v1220_v22 }
 0x38b   : > { %1237 = vst [vmem:[%s1956_s12 + $0x30] sm:$0xff] %v1221_v23 }
 0x38c   : > { %1238 = vst [vmem:[%s1956_s12 + $0x38] sm:$0xff] %v1222_v28 }
 0x38d   : > { %1239 = vst [vmem:[%s1956_s12 + $0x40] sm:$0xff] %v1223_v34 }
 0x38e   : > { %1240 = vst [vmem:[%s1956_s12 + $0x48] sm:$0xff] %v1224_v41 }
 0x38f   : > { %1241 = vst [vmem:[%s1956_s12 + $0x50] sm:$0xff] %v1225_v45 }
 0x390   : > { %1242 = vst [vmem:[%s1956_s12 + $0x58] sm:$0xff] %v1226_v52 }
 0x391   : > { %1243 = vst [vmem:[%s1956_s12 + $0x60] sm:$0xff] %v1227_v61 }
 0x392   : > { %1244 = vst [vmem:[%s1956_s12 + $0x68] sm:$0xff] %v1228_v17 }
 0x393   : > { %1245 = vst [vmem:[%s1956_s12 + $0x70] sm:$0xff] %v1229_v20 }
 0x394   : > { %1246 = vst [vmem:[%s1956_s12 + $0x78] sm:$0xff] %v1230_v24 }
 0x395   : > { %1532 = shalt.err (!%p1529_p10)
}
 0x396   : > { %s1582_s24 = smov 128   ;;  %s1583_s12 = smov 8  }
 0x397   : > { %1373 = dma.vmem_to_hbm [thread:$0]  (%p1696_p3), %s1261_s6, 2048, %s1263_s25, %s1248_s10, %s1582_s24, %s1582_s24, %s1583_s12  }
 0x398 PF: > { %s1277_s17 = sand.u32 1, %s1563_s26   ;;  %p2036_p12 = scmp.ge.s32.totalorder %s1575_s29, 2 }
 0x399   : > { %s1278_s15 = scalar_lea.sflag [#allocation6], %s1277_s17 }
 0x39a   : > { %p1384_p13 = pnand %p2036_p12, %p1662_p6 }
 0x39c   : > { %p1385_p0 = pneg %p1384_p13 }
 0x39e   : > { %1558 = dma.done.wait (%p1385_p0), %s1278_s15, 2048  }
 0x39f   : > { %1560 = vsyncadd (%p1385_p0), %s1278_s15, 4294965248  ;;  %p22_p5 = scmp.ge.s32.totalorder %s1680_s16, 4   ;;  %s2037_s26 = smov %s1567_s27 }
 0x3a0   : > { %s2038_s27 = smov %s1571_s28  ;;  %s2039_s28 = smov %s1692_s21 }
 0x3a1   : > { %s2040_s29 = smov %s1680_s16  ;;  %24 = sbr.rel (!%p22_p5) target bundleno = 8 (0x8), region = 111 }
 0x3a6   :  { %1284 = vsyncpa [#allocation5], 1 }
 0x3a7   :  { %1286 = vsyncpa [#allocation5 + $0x1], 1 }
 0x3a8   :  { %1287 = vsyncpa [#allocation8], 1 }
 0x3a9   :  { %1288 = vsyncpa [#allocation6], 1 }
 0x3aa   :  { %1290 = vsyncpa [#allocation6 + $0x1], 1 }

</bundles_post_ra>
